<compile_context>
chip_gen: v5e
topology: v5e:2x2
jax: 0.10.0
libtpu: 0.0.40
codegen_flags: <defaults>
</compile_context>

<pallas_src>
import jax
import jax.numpy as jnp
from jax.experimental import pallas as pl
from jax.experimental.pallas import tpu as pltpu

HIDDEN = (256, 256, 256)
N_OUT = 1
OUT_PAD = 128        # lane-dense padded width for the final layer / output store
DEFAULT_TB = 256     # batch tile: multiple of MXU M dim (256 on v6e/v7x, >=128 on v5e)


def _value_mlp_kernel(x_ref,
                      w1_ref, b1_ref,
                      w2_ref, b2_ref,
                      w3_ref, b3_ref,
                      w4_ref, b4_ref,
                      o_ref):
    # Layer 1: Linear + ReLU  (bf16 operands on the MXU, f32 accumulation)
    h = jnp.dot(x_ref[...].astype(jnp.bfloat16), w1_ref[...],
                preferred_element_type=jnp.float32)
    h = jnp.maximum(h + b1_ref[...], 0.0)
    # Layer 2: Linear + ReLU
    h = jnp.dot(h.astype(jnp.bfloat16), w2_ref[...],
                preferred_element_type=jnp.float32)
    h = jnp.maximum(h + b2_ref[...], 0.0)
    # Layer 3: Linear + ReLU
    h = jnp.dot(h.astype(jnp.bfloat16), w3_ref[...],
                preferred_element_type=jnp.float32)
    h = jnp.maximum(h + b3_ref[...], 0.0)
    # Layer 4: Linear, no activation.  w4 is zero-padded to OUT_PAD lanes so the store
    # is lane-dense; the wrapper slices column 0.  b4 is a scalar held in SMEM.
    out = jnp.dot(h.astype(jnp.bfloat16), w4_ref[...],
                  preferred_element_type=jnp.float32)
    o_ref[...] = out + b4_ref[0]


def value_network_forward(state, packed_params, tb=DEFAULT_TB):
    """state: (B, num_inputs) f32.  packed_params: output of pack_params()."""
    (w1, b1), (w2, b2), (w3, b3), (w4p, b4) = packed_params
    B, num_inputs = state.shape

    # Pad batch to a multiple of the batch tile (zero rows are sliced off afterwards).
    b_pad = pl.cdiv(B, tb) * tb
    if b_pad != B:
        state = jnp.pad(state, ((0, b_pad - B), (0, 0)))

    grid = (b_pad // tb,)
    const2 = lambda i: (0, 0)   # weights/biases: same block every grid step (stay resident)

    in_specs = [
        pl.BlockSpec((tb, num_inputs), lambda i: (i, 0)),        # streamed state tile
        pl.BlockSpec(w1.shape, const2), pl.BlockSpec(b1.shape, const2),
        pl.BlockSpec(w2.shape, const2), pl.BlockSpec(b2.shape, const2),
        pl.BlockSpec(w3.shape, const2), pl.BlockSpec(b3.shape, const2),
        pl.BlockSpec(w4p.shape, const2),
        pl.BlockSpec((1,), lambda i: (0,),
                     memory_space=pltpu.MemorySpace.SMEM),        # scalar b4 in SMEM
    ]
    out_specs = pl.BlockSpec((tb, OUT_PAD), lambda i: (i, 0))

    flops = 2 * b_pad * (num_inputs * 256 + 256 * 256 + 256 * 256 + 256 * OUT_PAD)
    bytes_accessed = (
        b_pad * num_inputs * 4
        + sum(int(a.size) * a.dtype.itemsize
              for a in (w1, b1, w2, b2, w3, b3, w4p, b4))
        + b_pad * OUT_PAD * 4)

    out = pl.pallas_call(
        _value_mlp_kernel,
        out_shape=jax.ShapeDtypeStruct((b_pad, OUT_PAD), jnp.float32),
        grid=grid,
        in_specs=in_specs,
        out_specs=out_specs,
        compiler_params=pltpu.CompilerParams(
            dimension_semantics=("parallel",)),
        cost_estimate=pl.CostEstimate(
            flops=flops, transcendentals=0, bytes_accessed=bytes_accessed),
    )(state, w1, b1, w2, b2, w3, b3, w4p, b4)

    return out[:B, :N_OUT]


def init_value_params(key, num_inputs):
    """Xavier-uniform weights (gain=1), zero biases — matches weights_init_.

    Returns math-layout f32 params: list of (W (in, out), b (out,))."""
    dims = (num_inputs,) + HIDDEN + (N_OUT,)
    params = []
    for i in range(len(dims) - 1):
        key, sub = jax.random.split(key)
        fan_in, fan_out = dims[i], dims[i + 1]
        limit = jnp.sqrt(6.0 / (fan_in + fan_out))
        w = jax.random.uniform(sub, (fan_in, fan_out), jnp.float32,
                               minval=-limit, maxval=limit)
        b = jnp.zeros((fan_out,), jnp.float32)
        params.append((w, b))
    return params


def pack_params(params):
    """One-time conversion to kernel layout: bf16 weights, (1,out) f32 biases,
    final weight zero-padded to OUT_PAD lanes, final bias as a (1,) SMEM scalar."""
    (w1, b1), (w2, b2), (w3, b3), (w4, b4) = params
    w4p = jnp.zeros((w4.shape[0], OUT_PAD), jnp.bfloat16)
    w4p = w4p.at[:, :N_OUT].set(w4.astype(jnp.bfloat16))
    return (
        (w1.astype(jnp.bfloat16), b1.reshape(1, -1).astype(jnp.float32)),
        (w2.astype(jnp.bfloat16), b2.reshape(1, -1).astype(jnp.float32)),
        (w3.astype(jnp.bfloat16), b3.reshape(1, -1).astype(jnp.float32)),
        (w4p, b4.reshape(-1).astype(jnp.float32)),
    )


def value_network_ref(state, params):
    """Pure-JAX reference mirroring the kernel's bf16-weight / bf16-activation,
    f32-accumulate numerics."""
    h = state
    n = len(params)
    for i, (w, b) in enumerate(params):
        h = jnp.dot(h.astype(jnp.bfloat16), w.astype(jnp.bfloat16),
                    preferred_element_type=jnp.float32) + b
        if i < n - 1:
            h = jnp.maximum(h, 0.0)
    return h


if __name__ == "__main__":
    key = jax.random.PRNGKey(0)
    batch = 8
    num_inputs = 32   # state dim
    hidden_dim = 256  # unused by the module's forward (hidden sizes hard-coded)

    k_param, k_state = jax.random.split(key)
    params = init_value_params(k_param, num_inputs)
    packed = pack_params(params)
    state = jax.random.normal(k_state, (batch, num_inputs), jnp.float32)

    out = value_network_forward(state, packed)
    out = jax.block_until_ready(out)

    ref = value_network_ref(state, params)
    assert out.shape == (batch, N_OUT), out.shape
    assert jnp.allclose(out, ref, atol=1e-3, rtol=1e-3), "mismatch vs reference"

    print("KERNEL_OK")
</pallas_src>

<mosaic_0001>
module attributes {stable_mosaic.version = 11 : i64} {
  func.func @_value_mlp_kernel(%arg0: i32, %arg1: memref<256x32xf32, #tpu.memory_space<vmem>>, %arg2: memref<32x256xbf16, #tpu.memory_space<vmem>>, %arg3: memref<1x256xf32, #tpu.memory_space<vmem>>, %arg4: memref<256x256xbf16, #tpu.memory_space<vmem>>, %arg5: memref<1x256xf32, #tpu.memory_space<vmem>>, %arg6: memref<256x256xbf16, #tpu.memory_space<vmem>>, %arg7: memref<1x256xf32, #tpu.memory_space<vmem>>, %arg8: memref<256x128xbf16, #tpu.memory_space<vmem>>, %arg9: memref<1xf32, #tpu.memory_space<smem>>, %arg10: memref<256x128xf32, #tpu.memory_space<vmem>>) attributes {dimension_semantics = [#tpu.dimension_semantics<parallel>], iteration_bounds = array<i64: 1>, scalar_prefetch = 0 : i64, scratch_operands = 0 : i64, tpu.core_type = #tpu.core_type<tc>, window_params = [{transform_indices = @transform_0, window_bounds = array<i64: 256, 32>}, {pipeline_mode = #tpu.pipeline_mode<synchronous>, transform_indices = @transform_1, window_bounds = array<i64: 32, 256>}, {pipeline_mode = #tpu.pipeline_mode<synchronous>, transform_indices = @transform_2, window_bounds = array<i64: 1, 256>}, {pipeline_mode = #tpu.pipeline_mode<synchronous>, transform_indices = @transform_3, window_bounds = array<i64: 256, 256>}, {pipeline_mode = #tpu.pipeline_mode<synchronous>, transform_indices = @transform_4, window_bounds = array<i64: 1, 256>}, {pipeline_mode = #tpu.pipeline_mode<synchronous>, transform_indices = @transform_5, window_bounds = array<i64: 256, 256>}, {pipeline_mode = #tpu.pipeline_mode<synchronous>, transform_indices = @transform_6, window_bounds = array<i64: 1, 256>}, {pipeline_mode = #tpu.pipeline_mode<synchronous>, transform_indices = @transform_7, window_bounds = array<i64: 256, 128>}, {transform_indices = @transform_8, window_bounds = array<i64: 1>}, {transform_indices = @transform_9, window_bounds = array<i64: 256, 128>}]} {
    %c0 = arith.constant 0 : index
    %c0_0 = arith.constant 0 : index
    %0 = vector.load %arg1[%c0, %c0_0] : memref<256x32xf32, #tpu.memory_space<vmem>>, vector<256x32xf32>
    %1 = arith.truncf %0 : vector<256x32xf32> to vector<256x32xbf16>
    %c0_1 = arith.constant 0 : index
    %c0_2 = arith.constant 0 : index
    %2 = vector.load %arg2[%c0_1, %c0_2] : memref<32x256xbf16, #tpu.memory_space<vmem>>, vector<32x256xbf16>
    %cst = arith.constant dense<0.000000e+00> : vector<256x256xf32>
    %3 = tpu.matmul %1, %2, %cst {dimension_numbers = #tpu.dot_dimension_numbers<[1], [0], [0], [1], [0, 0, 1, 1], [], []>} : vector<256x32xbf16>, vector<32x256xbf16>, vector<256x256xf32> -> vector<256x256xf32>
    %c0_3 = arith.constant 0 : index
    %c0_4 = arith.constant 0 : index
    %4 = vector.load %arg3[%c0_3, %c0_4] : memref<1x256xf32, #tpu.memory_space<vmem>>, vector<1x256xf32>
    %5 = vector.broadcast %4 : vector<1x256xf32> to vector<256x256xf32>
    %6 = arith.addf %3, %5 : vector<256x256xf32>
    %cst_5 = arith.constant 0.000000e+00 : f32
    %7 = vector.broadcast %cst_5 : f32 to vector<256x256xf32>
    %8 = arith.maximumf %6, %7 : vector<256x256xf32>
    %9 = arith.truncf %8 : vector<256x256xf32> to vector<256x256xbf16>
    %c0_6 = arith.constant 0 : index
    %c0_7 = arith.constant 0 : index
    %10 = vector.load %arg4[%c0_6, %c0_7] : memref<256x256xbf16, #tpu.memory_space<vmem>>, vector<256x256xbf16>
    %cst_8 = arith.constant dense<0.000000e+00> : vector<256x256xf32>
    %11 = tpu.matmul %9, %10, %cst_8 {dimension_numbers = #tpu.dot_dimension_numbers<[1], [0], [0], [1], [0, 0, 1, 1], [], []>} : vector<256x256xbf16>, vector<256x256xbf16>, vector<256x256xf32> -> vector<256x256xf32>
    %c0_9 = arith.constant 0 : index
    %c0_10 = arith.constant 0 : index
    %12 = vector.load %arg5[%c0_9, %c0_10] : memref<1x256xf32, #tpu.memory_space<vmem>>, vector<1x256xf32>
    %13 = vector.broadcast %12 : vector<1x256xf32> to vector<256x256xf32>
    %14 = arith.addf %11, %13 : vector<256x256xf32>
    %cst_11 = arith.constant 0.000000e+00 : f32
    %15 = vector.broadcast %cst_11 : f32 to vector<256x256xf32>
    %16 = arith.maximumf %14, %15 : vector<256x256xf32>
    %17 = arith.truncf %16 : vector<256x256xf32> to vector<256x256xbf16>
    %c0_12 = arith.constant 0 : index
    %c0_13 = arith.constant 0 : index
    %18 = vector.load %arg6[%c0_12, %c0_13] : memref<256x256xbf16, #tpu.memory_space<vmem>>, vector<256x256xbf16>
    %cst_14 = arith.constant dense<0.000000e+00> : vector<256x256xf32>
    %19 = tpu.matmul %17, %18, %cst_14 {dimension_numbers = #tpu.dot_dimension_numbers<[1], [0], [0], [1], [0, 0, 1, 1], [], []>} : vector<256x256xbf16>, vector<256x256xbf16>, vector<256x256xf32> -> vector<256x256xf32>
    %c0_15 = arith.constant 0 : index
    %c0_16 = arith.constant 0 : index
    %20 = vector.load %arg7[%c0_15, %c0_16] : memref<1x256xf32, #tpu.memory_space<vmem>>, vector<1x256xf32>
    %21 = vector.broadcast %20 : vector<1x256xf32> to vector<256x256xf32>
    %22 = arith.addf %19, %21 : vector<256x256xf32>
    %cst_17 = arith.constant 0.000000e+00 : f32
    %23 = vector.broadcast %cst_17 : f32 to vector<256x256xf32>
    %24 = arith.maximumf %22, %23 : vector<256x256xf32>
    %25 = arith.truncf %24 : vector<256x256xf32> to vector<256x256xbf16>
    %c0_18 = arith.constant 0 : index
    %c0_19 = arith.constant 0 : index
    %26 = vector.load %arg8[%c0_18, %c0_19] : memref<256x128xbf16, #tpu.memory_space<vmem>>, vector<256x128xbf16>
    %cst_20 = arith.constant dense<0.000000e+00> : vector<256x128xf32>
    %27 = tpu.matmul %25, %26, %cst_20 {dimension_numbers = #tpu.dot_dimension_numbers<[1], [0], [0], [1], [0, 0, 1, 1], [], []>} : vector<256x256xbf16>, vector<256x128xbf16>, vector<256x128xf32> -> vector<256x128xf32>
    %c0_21 = arith.constant 0 : index
    %28 = memref.load %arg9[%c0_21] : memref<1xf32, #tpu.memory_space<smem>>
    %29 = vector.broadcast %28 : f32 to vector<256x128xf32>
    %30 = arith.addf %27, %29 : vector<256x128xf32>
    %c0_22 = arith.constant 0 : index
    %c0_23 = arith.constant 0 : index
    %31 = vector.load %arg10[%c0_22, %c0_23] : memref<256x128xf32, #tpu.memory_space<vmem>>, vector<256x128xf32>
    tpu.vector_store %arg10[%c0_22, %c0_23], %30 {strides = array<i32>} : memref<256x128xf32, #tpu.memory_space<vmem>>, vector<256x128xf32>,
    return
  }
  func.func @transform_0(%arg0: i32) -> (i32, i32) {
    %c0_i32 = arith.constant 0 : i32
    %c0_i32_0 = arith.constant 0 : i32
    return %arg0, %c0_i32 : i32, i32
  }
  func.func @transform_1(%arg0: i32) -> (i32, i32) {
    %c0_i32 = arith.constant 0 : i32
    %c0_i32_0 = arith.constant 0 : i32
    %c0_i32_1 = arith.constant 0 : i32
    return %c0_i32, %c0_i32_0 : i32, i32
  }
  func.func @transform_2(%arg0: i32) -> (i32, i32) {
    %c0_i32 = arith.constant 0 : i32
    %c0_i32_0 = arith.constant 0 : i32
    %c0_i32_1 = arith.constant 0 : i32
    return %c0_i32, %c0_i32_0 : i32, i32
  }
  func.func @transform_3(%arg0: i32) -> (i32, i32) {
    %c0_i32 = arith.constant 0 : i32
    %c0_i32_0 = arith.constant 0 : i32
    %c0_i32_1 = arith.constant 0 : i32
    return %c0_i32, %c0_i32_0 : i32, i32
  }
  func.func @transform_4(%arg0: i32) -> (i32, i32) {
    %c0_i32 = arith.constant 0 : i32
    %c0_i32_0 = arith.constant 0 : i32
    %c0_i32_1 = arith.constant 0 : i32
    return %c0_i32, %c0_i32_0 : i32, i32
  }
  func.func @transform_5(%arg0: i32) -> (i32, i32) {
    %c0_i32 = arith.constant 0 : i32
    %c0_i32_0 = arith.constant 0 : i32
    %c0_i32_1 = arith.constant 0 : i32
    return %c0_i32, %c0_i32_0 : i32, i32
  }
  func.func @transform_6(%arg0: i32) -> (i32, i32) {
    %c0_i32 = arith.constant 0 : i32
    %c0_i32_0 = arith.constant 0 : i32
    %c0_i32_1 = arith.constant 0 : i32
    return %c0_i32, %c0_i32_0 : i32, i32
  }
  func.func @transform_7(%arg0: i32) -> (i32, i32) {
    %c0_i32 = arith.constant 0 : i32
    %c0_i32_0 = arith.constant 0 : i32
    %c0_i32_1 = arith.constant 0 : i32
    return %c0_i32, %c0_i32_0 : i32, i32
  }
  func.func @transform_8(%arg0: i32) -> i32 {
    %c0_i32 = arith.constant 0 : i32
    %c0_i32_0 = arith.constant 0 : i32
    return %c0_i32 : i32
  }
  func.func @transform_9(%arg0: i32) -> (i32, i32) {
    %c0_i32 = arith.constant 0 : i32
    %c0_i32_0 = arith.constant 0 : i32
    return %arg0, %c0_i32 : i32, i32
  }
}

</mosaic_0001>

<bundles_post_ra>
// kernel: tpu_custom_call.1
= control target key start
LH: loop header
LB: loop body
LE: loop exit
PB: predicated region body
PF: predicated region fallthrough
CT: control target
= control target key end

     0   :  { %15 = vsyncpa [#allocation4], 0  ;;  %s3643_s0 = inlined_call_operand.vmem [shape: f32[256,32], index: 0, kind: input, shape index: {}]   ;;  %s3644_s1 = inlined_call_operand.vmem [shape: bf16[32,256], index: 1, kind: input, shape index: {}]   ;;  %s3645_s2 = inlined_call_operand.vmem [shape: f32[1,256], index: 2, kind: input, shape index: {}]   ;;  %s3646_s3 = inlined_call_operand.vmem [shape: bf16[256,256], index: 3, kind: input, shape index: {}]   ;;  %s3647_s4 = inlined_call_operand.vmem [shape: f32[1,256], index: 4, kind: input, shape index: {}]   ;;  %s3648_s5 = inlined_call_operand.hbm [shape: bf16[256,256], index: 5, kind: input, shape index: {}]   ;;  %s3649_s6 = inlined_call_operand.vmem [shape: f32[1,256], index: 6, kind: input, shape index: {}]   ;;  %s3650_s7 = inlined_call_operand.hbm [shape: bf16[256,128], index: 7, kind: input, shape index: {}]   ;;  %s3651_s8 = inlined_call_operand.<no memory space> [shape: f32[1], index: 8, kind: input, shape index: {}]   ;;  %s3652_s9 = inlined_call_operand.hbm [shape: f32[256,128], index: 9, kind: output, shape index: {}]  }
   0x1   :  { %16 = vsyncpa [#allocation7], 0 }
   0x2   :  { %17 = vsyncpa [#allocation5], 0  ;;  %s32_s11 = sshll.u32 %s3648_s5, 4  ;;  %s2665_s12 = smov [#allocation3]   ;;  %s33_s11 = int_to_ptr.hbm [resolvable:$true] %s32_s11 }
   0x3   :  { %s34_s13 = sshll.u32 %s2665_s12, 4  ;;  %s47_s16 = sshll.u32 %s3650_s7, 4  ;;  %s35_s13 = int_to_ptr.vmem [resolvable:$true] %s34_s13  ;;  %s48_s16 = int_to_ptr.hbm [resolvable:$true] %s47_s16 }
   0x4   :  { %s2666_s17 = smov 128   ;;  %s2667_s18 = smov 8  }
   0x5   :  { %40 = dma.hbm_to_vmem [thread:$0]  %s33_s11, 4096, %s35_s13, [#allocation4], %s2666_s17, %s2666_s17, %s2667_s18  }
   0x6   :  { %s2668_s19 = smov [#allocation6]   ;;  %s2669_s21 = smov 64  }
   0x7   :  { %s49_s20 = sshll.u32 %s2668_s19, 4  ;;  %s2670_s5 = smov 4   ;;  %s50_s20 = int_to_ptr.vmem [resolvable:$true] %s49_s20 }
   0x8   :  { %55 = dma.hbm_to_vmem [thread:$0]  %s48_s16, 2048, %s50_s20, [#allocation7], %s2669_s21, %s2669_s21, %s2670_s5  }
   0x9   :  { %2659 = dma.done.wait [#allocation4], 4096  }
   0xa   :  { %2660 = vsyncadd [#allocation4], 4294963200 }
   0xb   :  { %2661 = dma.done.wait [#allocation7], 2048  }
   0xc   :  { %2662 = vsyncadd [#allocation7], 4294965248  ;;  %v2138_v0 = vld [vmem:[%s3644_s1 + $0x10] sm:$0xf]  ;;  %v2499_v1 = vld [vmem:[%s3644_s1 + $0x14] sm:$0xf0] }
   0xd   :  { %v2498_v2 = vld [vmem:[%s3644_s1 + $0x14] sm:$0xf]  ;;  %v2139_v3 = vor.u32 %v2499_v1, %v2138_v0  ;;  %v2140_v4 = vld [vmem:[%s3644_s1 + $0x18] sm:$0xf0]  ;;  %v2130_v5 = vld [vmem:[%s3644_s1] sm:$0xf] }
   0xe   :  { %v2497_v6 = vld [vmem:[%s3644_s1 + $0x4] sm:$0xf0]  ;;  %v2143_v7 = vor.u32 %v2498_v2, %v2140_v4  ;;  %v2496_v8 = vld [vmem:[%s3644_s1 + $0x4] sm:$0xf]  ;;  %v2132_v9 = vld [vmem:[%s3644_s1 + $0x8] sm:$0xf0] }
   0xf   :  { %v67_v10 = vld [vmem:[%s3643_s0] sm:$0xff]  ;;  %200 = vmatpush.bf16.msra.mxu0 %v2139_v3  ;;  %v2131_v11 = vor.u32 %v2497_v6, %v2130_v5  ;;  %v68_v12 = vld [vmem:[%s3643_s0 + $0x8] sm:$0xff]  ;;  %v2514_v13 = vld [vmem:[%s3646_s3 + $0x74] sm:$0xf]  ;;  %v2135_v15 = vor.u32 %v2496_v8, %v2132_v9  ;;  %vm145_vm0 = vcmask 261120   ;;  %s2114_s14 = sshll.u32 %s3652_s9, 4  ;;  %s2115_s14 = int_to_ptr.hbm [resolvable:$true] %s2114_s14 }
  0x10   :  { %v2236_v14 = vld [vmem:[%s3646_s3 + $0x78] sm:$0xf0]  ;;  %289 = vmatpush.bf16.msra.mxu1 %v2143_v7  ;;  %v2530_v17 = vld [vmem:[%s3646_s3 + $0xf4] sm:$0xf]  ;;  %v99_v20 = vpack.c.bf16 %v68_v12, %v67_v10  ;;  %v2512_v21 = vld [vmem:[%s3646_s3 + $0x64] sm:$0xf] }
  0x11   :  { %v2239_v16 = vor.u32 %v2514_v13, %v2236_v14  ;;  %v2300_v18 = vld [vmem:[%s3646_s3 + $0xf8] sm:$0xf0]  ;;  %v2228_v22 = vld [vmem:[%s3646_s3 + $0x68] sm:$0xf0]  ;;  %v2528_v23 = vld [vmem:[%s3646_s3 + $0xe4] sm:$0xf] }
  0x12   :  { %v2303_v19 = vor.u32 %v2530_v17, %v2300_v18  ;;  %v2231_v24 = vor.u32 %v2512_v21, %v2228_v22  ;;  %v2292_v25 = vld [vmem:[%s3646_s3 + $0xe8] sm:$0xf0]  ;;  %v69_v27 = vld [vmem:[%s3643_s0 + $0x10] sm:$0xff]  ;;  %v70_v28 = vld [vmem:[%s3643_s0 + $0x18] sm:$0xff] }
  0x13   :  { %201 = vmatpush.bf16.msra.mxu0 %v2131_v11  ;;  %v2295_v26 = vor.u32 %v2528_v23, %v2292_v25  ;;  %v100_v29 = vpack.c.bf16 %v70_v28, %v69_v27  ;;  %v71_v30 = vld [vmem:[%s3643_s0 + $0x20] sm:$0xff]  ;;  %v72_v31 = vld [vmem:[%s3643_s0 + $0x28] sm:$0xff]  ;;  %v2510_v33 = vld [vmem:[%s3646_s3 + $0x54] sm:$0xf] }
  0x14   :  { %290 = vmatpush.bf16.msra.mxu1 %v2135_v15  ;;  %v101_v32 = vpack.c.bf16 %v72_v31, %v71_v30  ;;  %v2220_v34 = vld [vmem:[%s3646_s3 + $0x58] sm:$0xf0]  ;;  %v2526_v35 = vld [vmem:[%s3646_s3 + $0xd4] sm:$0xf]  ;;  %v75_v42 = vld [vmem:[%s3643_s0 + $0x40] sm:$0xff] }
  0x15   :  { %v2223_v36 = vor.u32 %v2510_v33, %v2220_v34  ;;  %v2284_v37 = vld [vmem:[%s3646_s3 + $0xd8] sm:$0xf0]  ;;  %v73_v39 = vld [vmem:[%s3643_s0 + $0x30] sm:$0xff]  ;;  %v76_v43 = vld [vmem:[%s3643_s0 + $0x48] sm:$0xff] }
  0x16   :  { %2144 = vmatmul.msk.bf16.vlgmr.msra.gmra.mxu0 %vm145_vm0, %v99_v20  ;;  %v2287_v38 = vor.u32 %v2526_v35, %v2284_v37  ;;  %v74_v40 = vld [vmem:[%s3643_s0 + $0x38] sm:$0xff]  ;;  %v103_v44 = vpack.c.bf16 %v76_v43, %v75_v42  ;;  %v2508_v45 = vld [vmem:[%s3646_s3 + $0x44] sm:$0xf]  ;;  %v2212_v46 = vld [vmem:[%s3646_s3 + $0x48] sm:$0xf0] }
  0x17   :  { %844 = vmatpush.bf16.msrb.mxu0 %v2239_v16  ;;  %2160 = vmatmul.msk.bf16.vlgmr.msra.gmra.mxu1 %vm145_vm0, %v99_v20  ;;  %v102_v41 = vpack.c.bf16 %v74_v40, %v73_v39  ;;  %v2524_v47 = vld [vmem:[%s3646_s3 + $0xc4] sm:$0xf]  ;;  %v2215_v48 = vor.u32 %v2508_v45, %v2212_v46  ;;  %v2276_v49 = vld [vmem:[%s3646_s3 + $0xc8] sm:$0xf0]  ;;  %v2234_v50 = vld [vmem:[%s3646_s3 + $0x70] sm:$0xf] }
  0x18   :  { %933 = vmatpush.bf16.msrb.mxu1 %v2303_v19  ;;  %v2515_v51 = vld [vmem:[%s3646_s3 + $0x74] sm:$0xf0]  ;;  %v2279_v52 = vor.u32 %v2524_v47, %v2276_v49  ;;  %v2298_v54 = vld [vmem:[%s3646_s3 + $0xf0] sm:$0xf]  ;;  %v2226_v60 = vld [vmem:[%s3646_s3 + $0x60] sm:$0xf] }
  0x19   :  { %v2235_v53 = vor.u32 %v2515_v51, %v2234_v50  ;;  %v2531_v55 = vld [vmem:[%s3646_s3 + $0xf4] sm:$0xf0]  ;;  %v77_v57 = vld [vmem:[%s3643_s0 + $0x50] sm:$0xff]  ;;  %v2513_v61 = vld [vmem:[%s3646_s3 + $0x64] sm:$0xf0] }
  0x1a   :  { %v2299_v56 = vor.u32 %v2531_v55, %v2298_v54  ;;  %v78_v58 = vld [vmem:[%s3643_s0 + $0x58] sm:$0xff]  ;;  %v2290_v62 = vld [vmem:[%s3646_s3 + $0xe0] sm:$0xf]  ;;  %v2227_v63 = vor.u32 %v2513_v61, %v2226_v60  ;;  %v2529_v0 = vld [vmem:[%s3646_s3 + $0xe4] sm:$0xf0] }
  0x1b   :  { %845 = vmatpush.bf16.msrb.mxu0 %v2231_v24  ;;  %666 = vmatpush.bf16.msra.mxu2 %v2235_v53  ;;  %v104_v59 = vpack.c.bf16 %v78_v58, %v77_v57  ;;  %v2291_v1 = vor.u32 %v2529_v0, %v2290_v62  ;;  %v2218_v2 = vld [vmem:[%s3646_s3 + $0x50] sm:$0xf]  ;;  %v2511_v3 = vld [vmem:[%s3646_s3 + $0x54] sm:$0xf0]  ;;  %v2210_v8 = vld [vmem:[%s3646_s3 + $0x40] sm:$0xf] }
  0x1c   :  { %934 = vmatpush.bf16.msrb.mxu1 %v2295_v26  ;;  %755 = vmatpush.bf16.msra.mxu3 %v2299_v56  ;;  %v2282_v4 = vld [vmem:[%s3646_s3 + $0xd0] sm:$0xf]  ;;  %v2219_v5 = vor.u32 %v2511_v3, %v2218_v2  ;;  %v2527_v6 = vld [vmem:[%s3646_s3 + $0xd4] sm:$0xf0]  ;;  %v2509_v9 = vld [vmem:[%s3646_s3 + $0x44] sm:$0xf0] }
  0x1d   :  { %v2283_v7 = vor.u32 %v2527_v6, %v2282_v4  ;;  %v2274_v10 = vld [vmem:[%s3646_s3 + $0xc0] sm:$0xf]  ;;  %v2525_v11 = vld [vmem:[%s3646_s3 + $0xc4] sm:$0xf0]  ;;  %v2211_v12 = vor.u32 %v2509_v9, %v2210_v8  ;;  %v2202_v16 = vld [vmem:[%s3646_s3 + $0x30] sm:$0xf] }
  0x1e   :  { %v2275_v13 = vor.u32 %v2525_v11, %v2274_v10  ;;  %v79_v14 = vld [vmem:[%s3643_s0 + $0x60] sm:$0xff]  ;;  %v80_v15 = vld [vmem:[%s3643_s0 + $0x68] sm:$0xff]  ;;  %v2507_v17 = vld [vmem:[%s3646_s3 + $0x34] sm:$0xf0] }
  0x1f   :  { %846 = vmatpush.bf16.msrb.mxu0 %v2223_v36  ;;  %667 = vmatpush.bf16.msra.mxu2 %v2227_v63  ;;  %v2266_v18 = vld [vmem:[%s3646_s3 + $0xb0] sm:$0xf]  ;;  %v105_v19 = vpack.c.bf16 %v80_v15, %v79_v14  ;;  %v2203_v20 = vor.u32 %v2507_v17, %v2202_v16  ;;  %v2523_v21 = vld [vmem:[%s3646_s3 + $0xb4] sm:$0xf0]  ;;  %v2194_v23 = vld [vmem:[%s3646_s3 + $0x20] sm:$0xf] }
  0x20   :  { %935 = vmatpush.bf16.msrb.mxu1 %v2287_v38  ;;  %756 = vmatpush.bf16.msra.mxu3 %v2291_v1  ;;  %v2267_v22 = vor.u32 %v2523_v21, %v2266_v18  ;;  %v2505_v24 = vld [vmem:[%s3646_s3 + $0x24] sm:$0xf0]  ;;  %v2258_v26 = vld [vmem:[%s3646_s3 + $0xa0] sm:$0xf]  ;;  %v2506_v28 = vld [vmem:[%s3646_s3 + $0x34] sm:$0xf] }
  0x21   :  { %v2195_v25 = vor.u32 %v2505_v24, %v2194_v23  ;;  %v2521_v27 = vld [vmem:[%s3646_s3 + $0xa4] sm:$0xf0]  ;;  %v2522_v31 = vld [vmem:[%s3646_s3 + $0xb4] sm:$0xf]  ;;  %v2268_v33 = vld [vmem:[%s3646_s3 + $0xb8] sm:$0xf0] }
  0x22   :  { %v2259_v30 = vor.u32 %v2521_v27, %v2258_v26  ;;  %v2271_v34 = vor.u32 %v2522_v31, %v2268_v33  ;;  %v2186_v35 = vld [vmem:[%s3646_s3 + $0x10] sm:$0xf]  ;;  %v2503_v36 = vld [vmem:[%s3646_s3 + $0x14] sm:$0xf0]  ;;  %v2501_v42 = vld [vmem:[%s3646_s3 + $0x4] sm:$0xf0] }
  0x23   :  { %847 = vmatpush.bf16.msrb.mxu0 %v2215_v48  ;;  %668 = vmatpush.bf16.msra.mxu2 %v2219_v5  ;;  %v2250_v37 = vld [vmem:[%s3646_s3 + $0x90] sm:$0xf]  ;;  %v2187_v38 = vor.u32 %v2503_v36, %v2186_v35  ;;  %v2519_v39 = vld [vmem:[%s3646_s3 + $0x94] sm:$0xf0]  ;;  %v2242_v43 = vld [vmem:[%s3646_s3 + $0x80] sm:$0xf] }
  0x24   :  { %936 = vmatpush.bf16.msrb.mxu1 %v2279_v52  ;;  %757 = vmatpush.bf16.msra.mxu3 %v2283_v7  ;;  %v2251_v40 = vor.u32 %v2519_v39, %v2250_v37  ;;  %v2517_v45 = vld [vmem:[%s3646_s3 + $0x84] sm:$0xf0]  ;;  %v81_v46 = vld [vmem:[%s3643_s0 + $0x70] sm:$0xff]  ;;  %v82_v47 = vld [vmem:[%s3643_s0 + $0x78] sm:$0xff] }
  0x25   :  { %v2243_v48 = vor.u32 %v2517_v45, %v2242_v43  ;;  %v106_v49 = vpack.c.bf16 %v82_v47, %v81_v46  ;;  %v2362_v50 = vld [vmem:[#allocation3 + $0x70] sm:$0xf]  ;;  %v2547_v51 = vld [vmem:[#allocation3 + $0x74] sm:$0xf0]  ;;  %v83_v56 = vld [vmem:[%s3643_s0 + $0x80] sm:$0xff] }
  0x26   :  { %2145 = vmatmul.msk.bf16.gmra.mxu0 %vm145_vm0, %v100_v29  ;;  %v2363_v52 = vor.u32 %v2547_v51, %v2362_v50  ;;  %v2426_v53 = vld [vmem:[#allocation3 + $0xf0] sm:$0xf]  ;;  %v2563_v54 = vld [vmem:[#allocation3 + $0xf4] sm:$0xf0]  ;;  %v84_v57 = vld [vmem:[%s3643_s0 + $0x88] sm:$0xff] }
  0x27   :  { %2161 = vmatmul.msk.bf16.gmra.mxu1 %vm145_vm0, %v100_v29  ;;  %669 = vmatpush.bf16.msra.mxu2 %v2211_v12  ;;  %v2204_v29 = vld [vmem:[%s3646_s3 + $0x38] sm:$0xf0]  ;;  %v2427_v55 = vor.u32 %v2563_v54, %v2426_v53  ;;  %v107_v58 = vpack.c.bf16 %v84_v57, %v83_v56  ;;  %v2504_v0 = vld [vmem:[%s3646_s3 + $0x24] sm:$0xf]  ;;  %v2196_v1 = vld [vmem:[%s3646_s3 + $0x28] sm:$0xf0] }
  0x28   :  { %758 = vmatpush.bf16.msra.mxu3 %v2275_v13  ;;  %937 = vmatpush.bf16.msrb.mxu1 %v2271_v34  ;;  %v2199_v2 = vor.u32 %v2504_v0, %v2196_v1  ;;  %v2520_v3 = vld [vmem:[%s3646_s3 + $0xa4] sm:$0xf]  ;;  %v2260_v4 = vld [vmem:[%s3646_s3 + $0xa8] sm:$0xf0]  ;;  %v85_v16 = vld [vmem:[%s3643_s0 + $0x90] sm:$0xff] }
  0x29   :  { %v2263_v5 = vor.u32 %v2520_v3, %v2260_v4  ;;  %v86_v17 = vld [vmem:[%s3643_s0 + $0x98] sm:$0xff]  ;;  %v2545_v23 = vld [vmem:[#allocation3 + $0x64] sm:$0xf0]  ;;  %v2418_v26 = vld [vmem:[#allocation3 + $0xe0] sm:$0xf] }
  0x2a   :  { %v2561_v27 = vld [vmem:[#allocation3 + $0xe4] sm:$0xf0]  ;;  %v87_v39 = vld [vmem:[%s3643_s0 + $0xa0] sm:$0xff]  ;;  %v2502_v46 = vld [vmem:[%s3646_s3 + $0x14] sm:$0xf] }
  0x2b   :  { %670 = vmatpush.bf16.msra.mxu2 %v2203_v20  ;;  %v108_v20 = vpack.c.bf16 %v86_v17, %v85_v16  ;;  %v2188_v47 = vld [vmem:[%s3646_s3 + $0x18] sm:$0xf0]  ;;  %v89_v0 = vld [vmem:[%s3643_s0 + $0xb0] sm:$0xff] }
  0x2c   :  { %759 = vmatpush.bf16.msra.mxu3 %v2267_v22  ;;  %938 = vmatpush.bf16.msrb.mxu1 %v2263_v5  ;;  %v2354_v22 = vld [vmem:[#allocation3 + $0x60] sm:$0xf]  ;;  %v2252_v50 = vld [vmem:[%s3646_s3 + $0x98] sm:$0xf0] }
  0x2d   :  { %v90_v1 = vld [vmem:[%s3643_s0 + $0xb8] sm:$0xff] }
  0x2e   :  { %v110_v4 = vpack.c.bf16 %v90_v1, %v89_v0 }
  0x2f   :  { %671 = vmatpush.bf16.msra.mxu2 %v2195_v25  ;;  %v2355_v25 = vor.u32 %v2545_v23, %v2354_v22 }
  0x30   :  { %760 = vmatpush.bf16.msra.mxu3 %v2259_v30 }
  0x33   :  { %672 = vmatpush.bf16.msra.mxu2 %v2187_v38 }
  0x34   :  { %761 = vmatpush.bf16.msra.mxu3 %v2251_v40  ;;  %v88_v40 = vld [vmem:[%s3643_s0 + $0xa8] sm:$0xff] }
  0x35   :  { %v109_v43 = vpack.c.bf16 %v88_v40, %v87_v39 }
  0x36   :  { %2146 = vmatmul.msk.bf16.gmra.mxu0 %vm145_vm0, %v101_v32 }
  0x37   :  { %2162 = vmatmul.msk.bf16.gmra.mxu1 %vm145_vm0, %v101_v32  ;;  %v2207_v32 = vor.u32 %v2506_v28, %v2204_v29  ;;  %v2419_v28 = vor.u32 %v2561_v27, %v2418_v26  ;;  %v92_v26 = vld [vmem:[%s3643_s0 + $0xc8] sm:$0xff] }
  0x38   :  { %762 = vmatpush.bf16.msra.mxu3 %v2243_v48  ;;  %v2191_v48 = vor.u32 %v2502_v46, %v2188_v47 }
  0x39   :  { %848 = vmatpush.bf16.msrb.mxu0 %v2207_v32 }
  0x3c   :  { %1405 = vmatpush.bf16.msrb.mxu3 %v2427_v55 }
  0x3d   :  { %849 = vmatpush.bf16.msrb.mxu0 %v2199_v2 }
  0x40   :  { %1406 = vmatpush.bf16.msrb.mxu3 %v2419_v28 }
  0x41   :  { %850 = vmatpush.bf16.msrb.mxu0 %v2191_v48 }
  0x46   :  { %2147 = vmatmul.msk.bf16.gmra.mxu0 %vm145_vm0, %v102_v41 }
  0x47   :  { %2163 = vmatmul.msk.bf16.gmra.mxu1 %vm145_vm0, %v102_v41  ;;  %v2178_v41 = vld [vmem:[%s3646_s3] sm:$0xf] }
  0x56   :  { %2148 = vmatmul.msk.bf16.gmra.mxu0 %vm145_vm0, %v103_v44 }
  0x57   :  { %2164 = vmatmul.msk.bf16.gmra.mxu1 %vm145_vm0, %v103_v44  ;;  %v2179_v44 = vor.u32 %v2501_v42, %v2178_v41 }
  0x59   :  { %673 = vmatpush.bf16.msra.mxu2 %v2179_v44 }
  0x5d   :  { %1316 = vmatpush.bf16.msrb.mxu2 %v2363_v52 }
  0x61   :  { %1317 = vmatpush.bf16.msrb.mxu2 %v2355_v25  ;;  %v91_v25 = vld [vmem:[%s3643_s0 + $0xc0] sm:$0xff] }
  0x66   :  { %2149 = vmatmul.msk.bf16.gmra.mxu0 %vm145_vm0, %v104_v59 }
  0x67   :  { %2165 = vmatmul.msk.bf16.gmra.mxu1 %vm145_vm0, %v104_v59  ;;  %v119_v59 = vld [vmem:[%s3645_s2] sm:$0x3] }
  0x68   :  { %v2984_v62 = vperm.slane %v119_v59, 0  ;;  %v2987_v63 = vperm.slane %v119_v59, 1 }
  0x76   :  { %2150 = vmatmul.msk.bf16.gmra.mxu0 %vm145_vm0, %v105_v19 }
  0x77   :  { %2166 = vmatmul.msk.bf16.gmra.mxu1 %vm145_vm0, %v105_v19 }
  0x86   :  { %2151 = vmatmul.msk.bf16.gmra.mxu0 %vm145_vm0, %v106_v49 }
  0x87   :  { %2167 = vmatmul.msk.bf16.gmra.mxu1 %vm145_vm0, %v106_v49  ;;  %v2518_v49 = vld [vmem:[%s3646_s3 + $0x94] sm:$0xf] }
  0x88   :  { %v2255_v51 = vor.u32 %v2518_v49, %v2252_v50  ;;  %v93_v50 = vld [vmem:[%s3643_s0 + $0xd0] sm:$0xff] }
  0x8a   :  { %939 = vmatpush.bf16.msrb.mxu1 %v2255_v51  ;;  %v94_v51 = vld [vmem:[%s3643_s0 + $0xd8] sm:$0xff] }
  0x93   :  { %v203_v60 = vpop.f32.mrf.mxu0 }
  0x94   :  { %v292_v61 = vpop.f32.mrf.mxu1  ;;  %v204_v6 = vadd.f32 %v203_v60, %v2984_v62 }
  0x95   :  { %v293_v7 = vadd.f32 %v292_v61, %v2987_v63 }
  0x96   :  { %2152 = vmatmul.msk.bf16.gmra.mxu0 %vm145_vm0, %v107_v58  ;;  %v372_v12 = vmax.f32 %v204_v6, 0.0  ;;  %v2346_v6 = vld [vmem:[#allocation3 + $0x50] sm:$0xf] }
  0x97   :  { %2168 = vmatmul.msk.bf16.gmra.mxu1 %vm145_vm0, %v107_v58  ;;  %v373_v14 = vmax.f32 %v293_v7, 0.0  ;;  %v2543_v7 = vld [vmem:[#allocation3 + $0x54] sm:$0xf0] }
  0x9b   :  { %v205_v8 = vpop.f32.mrf.mxu0 }
  0x9c   :  { %v206_v9 = vadd.f32 %v205_v8, %v2984_v62  ;;  %v294_v10 = vpop.f32.mrf.mxu1 }
  0x9d   :  { %v295_v11 = vadd.f32 %v294_v10, %v2987_v63  ;;  %v2410_v10 = vld [vmem:[#allocation3 + $0xd0] sm:$0xf] }
  0x9e   :  { %v374_v13 = vmax.f32 %v206_v9, 0.0  ;;  %v2347_v9 = vor.u32 %v2543_v7, %v2346_v6 }
  0x9f   :  { %v375_v15 = vmax.f32 %v295_v11, 0.0  ;;  %v2559_v11 = vld [vmem:[#allocation3 + $0xd4] sm:$0xf0] }
  0xa0   :  { %v3012_v18 = vpack.c.bf16 %v374_v13, %v372_v12  ;;  %1318 = vmatpush.bf16.msrb.mxu2 %v2347_v9  ;;  %v2411_v12 = vor.u32 %v2559_v11, %v2410_v10 }
  0xa1   :  { %v3014_v19 = vpack.c.bf16 %v375_v15, %v373_v14 }
  0xa2   :  { %674 = vmatmul.bf16.vlgmr.msra.gmra.mxu2 %v3012_v18  ;;  %1407 = vmatpush.bf16.msrb.mxu3 %v2411_v12 }
  0xa3   :  { %763 = vmatmul.bf16.vlgmr.msra.gmra.mxu3 %v3014_v19  ;;  %v208_v21 = vpop.f32.mrf.mxu0 }
  0xa4   :  { %v297_v24 = vpop.f32.mrf.mxu1  ;;  %v209_v29 = vadd.f32 %v208_v21, %v2984_v62 }
  0xa5   :  { %v298_v30 = vadd.f32 %v297_v24, %v2987_v63 }
  0xa6   :  { %2153 = vmatmul.msk.bf16.gmra.mxu0 %vm145_vm0, %v108_v20  ;;  %v376_v35 = vmax.f32 %v209_v29, 0.0  ;;  %v111_v29 = vpack.c.bf16 %v92_v26, %v91_v25  ;;  %v2562_v25 = vld [vmem:[#allocation3 + $0xf4] sm:$0xf]  ;;  %v2428_v26 = vld [vmem:[#allocation3 + $0xf8] sm:$0xf0] }
  0xa7   :  { %2169 = vmatmul.msk.bf16.gmra.mxu1 %vm145_vm0, %v108_v20  ;;  %v377_v37 = vmax.f32 %v298_v30, 0.0 }
  0xab   :  { %v210_v31 = vpop.f32.mrf.mxu0 }
  0xac   :  { %v211_v32 = vadd.f32 %v210_v31, %v2984_v62  ;;  %v299_v33 = vpop.f32.mrf.mxu1 }
  0xad   :  { %v300_v34 = vadd.f32 %v299_v33, %v2987_v63  ;;  %v2180_v33 = vld [vmem:[%s3646_s3 + $0x8] sm:$0xf0] }
  0xae   :  { %v378_v36 = vmax.f32 %v211_v32, 0.0  ;;  %v2500_v32 = vld [vmem:[%s3646_s3 + $0x4] sm:$0xf] }
  0xaf   :  { %v379_v38 = vmax.f32 %v300_v34, 0.0  ;;  %v2183_v34 = vor.u32 %v2500_v32, %v2180_v33 }
  0xb0   :  { %v3030_v41 = vpack.c.bf16 %v378_v36, %v376_v35  ;;  %v2516_v35 = vld [vmem:[%s3646_s3 + $0x84] sm:$0xf]  ;;  %v2244_v36 = vld [vmem:[%s3646_s3 + $0x88] sm:$0xf0] }
  0xb1   :  { %v3032_v42 = vpack.c.bf16 %v379_v38, %v377_v37  ;;  %v2247_v37 = vor.u32 %v2516_v35, %v2244_v36  ;;  %851 = vmatpush.bf16.msrb.mxu0 %v2183_v34 }
  0xb2   :  { %679 = vmatmul.bf16.gmra.mxu2 %v3030_v41 }
  0xb3   :  { %768 = vmatmul.bf16.gmra.mxu3 %v3032_v42  ;;  %v213_v44 = vpop.f32.mrf.mxu0  ;;  %940 = vmatpush.bf16.msrb.mxu1 %v2247_v37 }
  0xb4   :  { %v302_v45 = vpop.f32.mrf.mxu1  ;;  %v214_v52 = vadd.f32 %v213_v44, %v2984_v62 }
  0xb5   :  { %v303_v53 = vadd.f32 %v302_v45, %v2987_v63 }
  0xb6   :  { %2154 = vmatmul.msk.bf16.gmra.mxu0 %vm145_vm0, %v109_v43  ;;  %v380_v58 = vmax.f32 %v214_v52, 0.0 }
  0xb7   :  { %2170 = vmatmul.msk.bf16.gmra.mxu1 %vm145_vm0, %v109_v43  ;;  %v381_v60 = vmax.f32 %v303_v53, 0.0 }
  0xbb   :  { %v215_v54 = vpop.f32.mrf.mxu0 }
  0xbc   :  { %v216_v55 = vadd.f32 %v215_v54, %v2984_v62  ;;  %v304_v56 = vpop.f32.mrf.mxu1  ;;  %v112_v54 = vpack.c.bf16 %v94_v51, %v93_v50 }
  0xbd   :  { %v305_v57 = vadd.f32 %v304_v56, %v2987_v63  ;;  %v2338_v56 = vld [vmem:[#allocation3 + $0x40] sm:$0xf] }
  0xbe   :  { %v382_v59 = vmax.f32 %v216_v55, 0.0 }
  0xbf   :  { %v383_v61 = vmax.f32 %v305_v57, 0.0  ;;  %v2541_v57 = vld [vmem:[#allocation3 + $0x44] sm:$0xf0] }
  0xc0   :  { %v3060_v2 = vpack.c.bf16 %v382_v59, %v380_v58  ;;  %v2339_v59 = vor.u32 %v2541_v57, %v2338_v56 }
  0xc1   :  { %v3062_v3 = vpack.c.bf16 %v383_v61, %v381_v60  ;;  %v2402_v60 = vld [vmem:[#allocation3 + $0xc0] sm:$0xf]  ;;  %v2557_v61 = vld [vmem:[#allocation3 + $0xc4] sm:$0xf0] }
  0xc2   :  { %684 = vmatmul.bf16.gmra.mxu2 %v3060_v2  ;;  %v2403_v0 = vor.u32 %v2557_v61, %v2402_v60 }
  0xc3   :  { %773 = vmatmul.bf16.gmra.mxu3 %v3062_v3  ;;  %v218_v5 = vpop.f32.mrf.mxu0  ;;  %1319 = vmatpush.bf16.msrb.mxu2 %v2339_v59 }
  0xc4   :  { %v307_v8 = vpop.f32.mrf.mxu1  ;;  %v219_v13 = vadd.f32 %v218_v5, %v2984_v62  ;;  %1408 = vmatpush.bf16.msrb.mxu3 %v2403_v0 }
  0xc5   :  { %v308_v14 = vadd.f32 %v307_v8, %v2987_v63 }
  0xc6   :  { %2155 = vmatmul.msk.bf16.gmra.mxu0 %vm145_vm0, %v110_v4  ;;  %v384_v21 = vmax.f32 %v219_v13, 0.0  ;;  %v95_v13 = vld [vmem:[%s3643_s0 + $0xe0] sm:$0xff] }
  0xc7   :  { %2171 = vmatmul.msk.bf16.gmra.mxu1 %vm145_vm0, %v110_v4  ;;  %v385_v23 = vmax.f32 %v308_v14, 0.0  ;;  %v96_v14 = vld [vmem:[%s3643_s0 + $0xe8] sm:$0xff] }
  0xcb   :  { %v220_v15 = vpop.f32.mrf.mxu0 }
  0xcc   :  { %v221_v16 = vadd.f32 %v220_v15, %v2984_v62  ;;  %v309_v17 = vpop.f32.mrf.mxu1 }
  0xcd   :  { %v310_v20 = vadd.f32 %v309_v17, %v2987_v63  ;;  %v113_v17 = vpack.c.bf16 %v96_v14, %v95_v13  ;;  %v2356_v13 = vld [vmem:[#allocation3 + $0x68] sm:$0xf0]  ;;  %v2560_v14 = vld [vmem:[#allocation3 + $0xe4] sm:$0xf] }
  0xce   :  { %v386_v22 = vmax.f32 %v221_v16, 0.0 }
  0xcf   :  { %v387_v24 = vmax.f32 %v310_v20, 0.0 }
  0xd0   :  { %v3078_v27 = vpack.c.bf16 %v386_v22, %v384_v21  ;;  %v2546_v22 = vld [vmem:[#allocation3 + $0x74] sm:$0xf] }
  0xd1   :  { %v3080_v28 = vpack.c.bf16 %v387_v24, %v385_v23  ;;  %v2364_v23 = vld [vmem:[#allocation3 + $0x78] sm:$0xf0] }
  0xd2   :  { %689 = vmatmul.bf16.gmra.mxu2 %v3078_v27  ;;  %v2367_v24 = vor.u32 %v2546_v22, %v2364_v23  ;;  %v2420_v22 = vld [vmem:[#allocation3 + $0xe8] sm:$0xf0] }
  0xd3   :  { %778 = vmatmul.bf16.gmra.mxu3 %v3080_v28  ;;  %v223_v30 = vpop.f32.mrf.mxu0 }
  0xd4   :  { %v312_v31 = vpop.f32.mrf.mxu1  ;;  %v224_v38 = vadd.f32 %v223_v30, %v2984_v62  ;;  %1494 = vmatpush.bf16.msra.mxu0 %v2367_v24 }
  0xd5   :  { %v313_v39 = vadd.f32 %v312_v31, %v2987_v63 }
  0xd6   :  { %2156 = vmatmul.msk.bf16.gmra.mxu0 %vm145_vm0, %v111_v29  ;;  %v388_v46 = vmax.f32 %v224_v38, 0.0 }
  0xd7   :  { %2172 = vmatmul.msk.bf16.gmra.mxu1 %vm145_vm0, %v111_v29  ;;  %v389_v48 = vmax.f32 %v313_v39, 0.0  ;;  %v2431_v29 = vor.u32 %v2562_v25, %v2428_v26  ;;  %v2423_v25 = vor.u32 %v2560_v14, %v2420_v22 }
  0xd9   :  { %1583 = vmatpush.bf16.msra.mxu1 %v2431_v29 }
  0xdb   :  { %v225_v40 = vpop.f32.mrf.mxu0 }
  0xdc   :  { %v226_v43 = vadd.f32 %v225_v40, %v2984_v62  ;;  %v314_v44 = vpop.f32.mrf.mxu1  ;;  %v97_v40 = vld [vmem:[%s3643_s0 + $0xf0] sm:$0xff] }
  0xdd   :  { %v315_v45 = vadd.f32 %v314_v44, %v2987_v63  ;;  %1584 = vmatpush.bf16.msra.mxu1 %v2423_v25 }
  0xde   :  { %v390_v47 = vmax.f32 %v226_v43, 0.0  ;;  %v98_v43 = vld [vmem:[%s3643_s0 + $0xf8] sm:$0xff] }
  0xdf   :  { %v391_v49 = vmax.f32 %v315_v45, 0.0 }
  0xe0   :  { %v3108_v52 = vpack.c.bf16 %v390_v47, %v388_v46  ;;  %v114_v46 = vpack.c.bf16 %v98_v43, %v97_v40 }
  0xe1   :  { %v3110_v53 = vpack.c.bf16 %v391_v49, %v389_v48  ;;  %v2330_v48 = vld [vmem:[#allocation3 + $0x30] sm:$0xf]  ;;  %v2539_v49 = vld [vmem:[#allocation3 + $0x34] sm:$0xf0] }
  0xe2   :  { %694 = vmatmul.bf16.gmra.mxu2 %v3108_v52  ;;  %v2331_v51 = vor.u32 %v2539_v49, %v2330_v48  ;;  %v2553_v48 = vld [vmem:[#allocation3 + $0xa4] sm:$0xf0] }
  0xe3   :  { %783 = vmatmul.bf16.gmra.mxu3 %v3110_v53  ;;  %v228_v55 = vpop.f32.mrf.mxu0 }
  0xe4   :  { %v317_v58 = vpop.f32.mrf.mxu1  ;;  %v229_v1 = vadd.f32 %v228_v55, %v2984_v62  ;;  %1320 = vmatpush.bf16.msrb.mxu2 %v2331_v51  ;;  %v2555_v55 = vld [vmem:[#allocation3 + $0xb4] sm:$0xf0] }
  0xe5   :  { %v318_v4 = vadd.f32 %v317_v58, %v2987_v63 }
  0xe6   :  { %2157 = vmatmul.msk.bf16.gmra.mxu0 %vm145_vm0, %v112_v54  ;;  %v392_v9 = vmax.f32 %v229_v1, 0.0 }
  0xe7   :  { %2173 = vmatmul.msk.bf16.gmra.mxu1 %vm145_vm0, %v112_v54  ;;  %v393_v11 = vmax.f32 %v318_v4, 0.0  ;;  %v2394_v54 = vld [vmem:[#allocation3 + $0xb0] sm:$0xf] }
  0xe8   :  { %v2395_v56 = vor.u32 %v2555_v55, %v2394_v54 }
  0xea   :  { %1409 = vmatpush.bf16.msrb.mxu3 %v2395_v56 }
  0xeb   :  { %v230_v5 = vpop.f32.mrf.mxu0 }
  0xec   :  { %v231_v6 = vadd.f32 %v230_v5, %v2984_v62  ;;  %v319_v7 = vpop.f32.mrf.mxu1 }
  0xed   :  { %v320_v8 = vadd.f32 %v319_v7, %v2987_v63 }
  0xee   :  { %v394_v10 = vmax.f32 %v231_v6, 0.0 }
  0xef   :  { %v395_v12 = vmax.f32 %v320_v8, 0.0 }
  0xf0   :  { %v3126_v15 = vpack.c.bf16 %v394_v10, %v392_v9 }
  0xf1   :  { %v3128_v16 = vpack.c.bf16 %v395_v12, %v393_v11  ;;  %v2544_v12 = vld [vmem:[#allocation3 + $0x64] sm:$0xf] }
  0xf2   :  { %699 = vmatmul.bf16.gmra.mxu2 %v3126_v15 }
  0xf3   :  { %788 = vmatmul.bf16.gmra.mxu3 %v3128_v16  ;;  %v233_v20 = vpop.f32.mrf.mxu0 }
  0xf4   :  { %v322_v21 = vpop.f32.mrf.mxu1  ;;  %v234_v30 = vadd.f32 %v233_v20, %v2984_v62 }
  0xf5   :  { %v323_v31 = vadd.f32 %v322_v21, %v2987_v63  ;;  %v2359_v21 = vor.u32 %v2544_v12, %v2356_v13 }
  0xf6   :  { %2158 = vmatmul.msk.bf16.gmra.mxu0 %vm145_vm0, %v113_v17  ;;  %v396_v36 = vmax.f32 %v234_v30, 0.0 }
  0xf7   :  { %2174 = vmatmul.msk.bf16.gmra.mxu1 %vm145_vm0, %v113_v17  ;;  %v397_v38 = vmax.f32 %v323_v31, 0.0  ;;  %1495 = vmatpush.bf16.msra.mxu0 %v2359_v21  ;;  %v3171_v31 = vld [vmem:[%s3647_s4] sm:$0x3] }
  0xfb   :  { %v235_v32 = vpop.f32.mrf.mxu0 }
  0xfc   :  { %v236_v33 = vadd.f32 %v235_v32, %v2984_v62  ;;  %v324_v34 = vpop.f32.mrf.mxu1 }
  0xfd   :  { %v325_v35 = vadd.f32 %v324_v34, %v2987_v63  ;;  %v3179_v34 = vperm.slane %v3171_v31, 0 }
  0xfe   :  { %v398_v37 = vmax.f32 %v236_v33, 0.0 }
  0xff   :  { %v399_v39 = vmax.f32 %v325_v35, 0.0 }
 0x100   :  { %v3144_v44 = vpack.c.bf16 %v398_v37, %v396_v36  ;;  %v2322_v36 = vld [vmem:[#allocation3 + $0x20] sm:$0xf]  ;;  %v2537_v37 = vld [vmem:[#allocation3 + $0x24] sm:$0xf0] }
 0x101   :  { %v3146_v45 = vpack.c.bf16 %v399_v39, %v397_v38  ;;  %v2323_v39 = vor.u32 %v2537_v37, %v2322_v36 }
 0x102   :  { %704 = vmatmul.bf16.gmra.mxu2 %v3144_v44 }
 0x103   :  { %793 = vmatmul.bf16.gmra.mxu3 %v3146_v45  ;;  %v238_v47 = vpop.f32.mrf.mxu0  ;;  %1321 = vmatpush.bf16.msrb.mxu2 %v2323_v39 }
 0x104   :  { %v327_v50 = vpop.f32.mrf.mxu1  ;;  %v239_v57 = vadd.f32 %v238_v47, %v2984_v62  ;;  %v2386_v47 = vld [vmem:[#allocation3 + $0xa0] sm:$0xf] }
 0x105   :  { %v328_v58 = vadd.f32 %v327_v50, %v2987_v63  ;;  %v2387_v50 = vor.u32 %v2553_v48, %v2386_v47 }
 0x106   :  { %2159 = vmatmul.msk.bf16.gmra.mxu0 %vm145_vm0, %v114_v46  ;;  %v400_v1 = vmax.f32 %v239_v57, 0.0 }
 0x107   :  { %2175 = vmatmul.msk.bf16.gmra.mxu1 %vm145_vm0, %v114_v46  ;;  %v401_v5 = vmax.f32 %v328_v58, 0.0  ;;  %1410 = vmatpush.bf16.msrb.mxu3 %v2387_v50 }
 0x10b   :  { %v240_v59 = vpop.f32.mrf.mxu0 }
 0x10c   :  { %v241_v60 = vadd.f32 %v240_v59, %v2984_v62  ;;  %v329_v61 = vpop.f32.mrf.mxu1 }
 0x10d   :  { %v330_v0 = vadd.f32 %v329_v61, %v2987_v63 }
 0x10e   :  { %v402_v4 = vmax.f32 %v241_v60, 0.0 }
 0x10f   :  { %v403_v6 = vmax.f32 %v330_v0, 0.0 }
 0x110   :  { %v3156_v7 = vpack.c.bf16 %v402_v4, %v400_v1 }
 0x111   :  { %v3158_v8 = vpack.c.bf16 %v403_v6, %v401_v5 }
 0x112   :  { %709 = vmatmul.bf16.gmra.mxu2 %v3156_v7 }
 0x113   :  { %798 = vmatmul.bf16.gmra.mxu3 %v3158_v8  ;;  %v243_v9 = vpop.f32.mrf.mxu0 }
 0x114   :  { %v332_v10 = vpop.f32.mrf.mxu1  ;;  %v244_v11 = vadd.f32 %v243_v9, %v2984_v62 }
 0x115   :  { %v333_v17 = vadd.f32 %v332_v10, %v2987_v63 }
 0x116   :  { %852 = vmatmul.bf16.vlgmr.msrb.gmra.mxu0 %v3012_v18  ;;  %v404_v18 = vmax.f32 %v244_v11, 0.0 }
 0x117   :  { %941 = vmatmul.bf16.vlgmr.msrb.gmra.mxu1 %v3014_v19  ;;  %v405_v19 = vmax.f32 %v333_v17, 0.0 }
 0x11b   :  { %v245_v20 = vpop.f32.mrf.mxu0 }
 0x11c   :  { %v246_v23 = vadd.f32 %v245_v20, %v2984_v62  ;;  %v334_v24 = vpop.f32.mrf.mxu1 }
 0x11d   :  { %v335_v26 = vadd.f32 %v334_v24, %v2987_v63  ;;  %v2348_v24 = vld [vmem:[#allocation3 + $0x58] sm:$0xf0] }
 0x11e   :  { %v406_v29 = vmax.f32 %v246_v23, 0.0  ;;  %v2542_v23 = vld [vmem:[#allocation3 + $0x54] sm:$0xf] }
 0x11f   :  { %v407_v30 = vmax.f32 %v335_v26, 0.0 }
 0x120   :  { %v3173_v32 = vpack.c.bf16 %v406_v29, %v404_v18  ;;  %v2351_v18 = vor.u32 %v2542_v23, %v2348_v24  ;;  %v2558_v29 = vld [vmem:[#allocation3 + $0xd4] sm:$0xf] }
 0x121   :  { %v3175_v33 = vpack.c.bf16 %v407_v30, %v405_v19  ;;  %v2412_v19 = vld [vmem:[#allocation3 + $0xd8] sm:$0xf0] }
 0x122   :  { %714 = vmatmul.bf16.gmra.mxu2 %v3173_v32  ;;  %v2415_v36 = vor.u32 %v2558_v29, %v2412_v19  ;;  %1496 = vmatpush.bf16.msra.mxu0 %v2351_v18 }
 0x123   :  { %803 = vmatmul.bf16.gmra.mxu3 %v3175_v33  ;;  %v248_v35 = vpop.f32.mrf.mxu0 }
 0x124   :  { %v337_v38 = vpop.f32.mrf.mxu1  ;;  %v249_v51 = vadd.f32 %v248_v35, %v2984_v62  ;;  %1585 = vmatpush.bf16.msra.mxu1 %v2415_v36 }
 0x125   :  { %v675_v40 = vpop.f32.mrf.mxu2  ;;  %v338_v54 = vadd.f32 %v337_v38, %v2987_v63 }
 0x126   :  { %v676_v43 = vadd.f32 %v675_v40, %v3179_v34  ;;  %v764_v46 = vpop.f32.mrf.mxu3  ;;  %857 = vmatmul.bf16.gmra.mxu0 %v3030_v41  ;;  %v408_v41 = vmax.f32 %v249_v51, 0.0 }
 0x127   :  { %946 = vmatmul.bf16.gmra.mxu1 %v3032_v42  ;;  %v409_v0 = vmax.f32 %v338_v54, 0.0 }
 0x128   :  { %v765_v49 = vadd.f32 %v764_v46, %v676_v43 }
 0x12a   :  { %v1022_v9 = vmax.f32 %v765_v49, 0.0 }
 0x12b   :  { %v250_v55 = vpop.f32.mrf.mxu0 }
 0x12c   :  { %v251_v56 = vadd.f32 %v250_v55, %v2984_v62  ;;  %v339_v57 = vpop.f32.mrf.mxu1  ;;  %v2314_v55 = vld [vmem:[#allocation3 + $0x10] sm:$0xf] }
 0x12d   :  { %v340_v58 = vadd.f32 %v339_v57, %v2987_v63  ;;  %v677_v59 = vpop.f32.mrf.mxu2 }
 0x12e   :  { %v410_v60 = vmax.f32 %v251_v56, 0.0  ;;  %v678_v42 = vadd.f32 %v677_v59, %v3179_v34  ;;  %v766_v61 = vpop.f32.mrf.mxu3  ;;  %v2535_v56 = vld [vmem:[#allocation3 + $0x14] sm:$0xf0] }
 0x12f   :  { %v411_v1 = vmax.f32 %v340_v58, 0.0  ;;  %v2315_v58 = vor.u32 %v2535_v56, %v2314_v55 }
 0x130   :  { %v767_v4 = vadd.f32 %v766_v61, %v678_v42  ;;  %v3190_v5 = vpack.c.bf16 %v410_v60, %v408_v41  ;;  %v2378_v61 = vld [vmem:[#allocation3 + $0x90] sm:$0xf] }
 0x131   :  { %v3192_v6 = vpack.c.bf16 %v411_v1, %v409_v0  ;;  %1322 = vmatpush.bf16.msrb.mxu2 %v2315_v58  ;;  %v2551_v0 = vld [vmem:[#allocation3 + $0x94] sm:$0xf0] }
 0x132   :  { %v1024_v10 = vmax.f32 %v767_v4, 0.0  ;;  %719 = vmatmul.bf16.gmra.mxu2 %v3190_v5  ;;  %v2379_v4 = vor.u32 %v2551_v0, %v2378_v61 }
 0x133   :  { %808 = vmatmul.bf16.gmra.mxu3 %v3192_v6  ;;  %v253_v11 = vpop.f32.mrf.mxu0 }
 0x134   :  { %v3196_v12 = vpack.c.bf16 %v1024_v10, %v1022_v9  ;;  %v342_v13 = vpop.f32.mrf.mxu1  ;;  %v254_v22 = vadd.f32 %v253_v11, %v2984_v62  ;;  %1411 = vmatpush.bf16.msrb.mxu3 %v2379_v4 }
 0x135   :  { %v680_v14 = vpop.f32.mrf.mxu2  ;;  %v343_v25 = vadd.f32 %v342_v13, %v2987_v63 }
 0x136   :  { %v681_v17 = vadd.f32 %v680_v14, %v3179_v34  ;;  %v769_v20 = vpop.f32.mrf.mxu3  ;;  %862 = vmatmul.bf16.gmra.mxu0 %v3060_v2 }
 0x137   :  { %951 = vmatmul.bf16.gmra.mxu1 %v3062_v3  ;;  %v412_v3 = vmax.f32 %v254_v22, 0.0  ;;  %v413_v43 = vmax.f32 %v343_v25, 0.0 }
 0x138   :  { %v770_v21 = vadd.f32 %v769_v20, %v681_v17 }
 0x13a   :  { %v1026_v50 = vmax.f32 %v770_v21, 0.0 }
 0x13b   :  { %v255_v26 = vpop.f32.mrf.mxu0 }
 0x13c   :  { %v256_v30 = vadd.f32 %v255_v26, %v2984_v62  ;;  %v344_v35 = vpop.f32.mrf.mxu1 }
 0x13d   :  { %v345_v37 = vadd.f32 %v344_v35, %v2987_v63  ;;  %v682_v2 = vpop.f32.mrf.mxu2 }
 0x13e   :  { %v414_v38 = vmax.f32 %v256_v30, 0.0  ;;  %v683_v39 = vadd.f32 %v682_v2, %v3179_v34  ;;  %v771_v40 = vpop.f32.mrf.mxu3 }
 0x13f   :  { %v415_v46 = vmax.f32 %v345_v37, 0.0 }
 0x140   :  { %v772_v47 = vadd.f32 %v771_v40, %v683_v39  ;;  %v3206_v48 = vpack.c.bf16 %v414_v38, %v412_v3  ;;  %v2540_v40 = vld [vmem:[#allocation3 + $0x44] sm:$0xf] }
 0x141   :  { %v3208_v49 = vpack.c.bf16 %v415_v46, %v413_v43  ;;  %v2340_v43 = vld [vmem:[#allocation3 + $0x48] sm:$0xf0] }
 0x142   :  { %v1028_v51 = vmax.f32 %v772_v47, 0.0  ;;  %724 = vmatmul.bf16.gmra.mxu2 %v3206_v48 }
 0x143   :  { %813 = vmatmul.bf16.gmra.mxu3 %v3208_v49  ;;  %v258_v54 = vpop.f32.mrf.mxu0 }
 0x144   :  { %v347_v57 = vpop.f32.mrf.mxu1  ;;  %v3212_v59 = vpack.c.bf16 %v1028_v51, %v1026_v50  ;;  %v259_v9 = vadd.f32 %v258_v54, %v2984_v62  ;;  %v2343_v50 = vor.u32 %v2540_v40, %v2340_v43  ;;  %v2556_v51 = vld [vmem:[#allocation3 + $0xc4] sm:$0xf]  ;;  %v2404_v54 = vld [vmem:[#allocation3 + $0xc8] sm:$0xf0] }
 0x145   :  { %v685_v41 = vpop.f32.mrf.mxu2  ;;  %v348_v10 = vadd.f32 %v347_v57, %v2987_v63  ;;  %v2407_v57 = vor.u32 %v2556_v51, %v2404_v54 }
 0x146   :  { %v686_v60 = vadd.f32 %v685_v41, %v3179_v34  ;;  %v774_v42 = vpop.f32.mrf.mxu3  ;;  %867 = vmatmul.bf16.gmra.mxu0 %v3078_v27  ;;  %v416_v27 = vmax.f32 %v259_v9, 0.0 }
 0x147   :  { %956 = vmatmul.bf16.gmra.mxu1 %v3080_v28  ;;  %v417_v23 = vmax.f32 %v348_v10, 0.0  ;;  %1497 = vmatpush.bf16.msra.mxu0 %v2343_v50 }
 0x148   :  { %v775_v1 = vadd.f32 %v774_v42, %v686_v60  ;;  %1586 = vmatpush.bf16.msra.mxu1 %v2407_v57 }
 0x14a   :  { %v1030_v29 = vmax.f32 %v775_v1, 0.0 }
 0x14b   :  { %v260_v11 = vpop.f32.mrf.mxu0 }
 0x14c   :  { %v261_v13 = vadd.f32 %v260_v11, %v2984_v62  ;;  %v349_v14 = vpop.f32.mrf.mxu1 }
 0x14d   :  { %v350_v17 = vadd.f32 %v349_v14, %v2987_v63  ;;  %v687_v20 = vpop.f32.mrf.mxu2  ;;  %v2306_v14 = vld [vmem:[#allocation3] sm:$0xf] }
 0x14e   :  { %v418_v21 = vmax.f32 %v261_v13, 0.0  ;;  %v688_v28 = vadd.f32 %v687_v20, %v3179_v34  ;;  %v776_v22 = vpop.f32.mrf.mxu3 }
 0x14f   :  { %v419_v24 = vmax.f32 %v350_v17, 0.0  ;;  %v2533_v17 = vld [vmem:[#allocation3 + $0x4] sm:$0xf0] }
 0x150   :  { %v777_v25 = vadd.f32 %v776_v22, %v688_v28  ;;  %v3222_v26 = vpack.c.bf16 %v418_v21, %v416_v27  ;;  %v2307_v27 = vor.u32 %v2533_v17, %v2306_v14  ;;  %v2554_v14 = vld [vmem:[#allocation3 + $0xb4] sm:$0xf]  ;;  %v2396_v17 = vld [vmem:[#allocation3 + $0xb8] sm:$0xf0] }
 0x151   :  { %v3224_v18 = vpack.c.bf16 %v419_v24, %v417_v23  ;;  %v2370_v24 = vld [vmem:[#allocation3 + $0x80] sm:$0xf] }
 0x152   :  { %v1032_v19 = vmax.f32 %v777_v25, 0.0  ;;  %729 = vmatmul.bf16.gmra.mxu2 %v3222_v26  ;;  %v2549_v25 = vld [vmem:[#allocation3 + $0x84] sm:$0xf0] }
 0x153   :  { %818 = vmatmul.bf16.gmra.mxu3 %v3224_v18  ;;  %v263_v30 = vpop.f32.mrf.mxu0  ;;  %1323 = vmatpush.bf16.msrb.mxu2 %v2307_v27 }
 0x154   :  { %v352_v35 = vpop.f32.mrf.mxu1  ;;  %v3228_v36 = vpack.c.bf16 %v1032_v19, %v1030_v29  ;;  %v264_v39 = vadd.f32 %v263_v30, %v2984_v62  ;;  %v2371_v19 = vor.u32 %v2549_v25, %v2370_v24 }
 0x155   :  { %v690_v37 = vpop.f32.mrf.mxu2  ;;  %v353_v46 = vadd.f32 %v352_v35, %v2987_v63 }
 0x156   :  { %v691_v2 = vadd.f32 %v690_v37, %v3179_v34  ;;  %v779_v3 = vpop.f32.mrf.mxu3  ;;  %872 = vmatmul.bf16.gmra.mxu0 %v3108_v52  ;;  %1412 = vmatpush.bf16.msrb.mxu3 %v2371_v19 }
 0x157   :  { %961 = vmatmul.bf16.gmra.mxu1 %v3110_v53  ;;  %v420_v53 = vmax.f32 %v264_v39, 0.0  ;;  %v421_v61 = vmax.f32 %v353_v46, 0.0 }
 0x158   :  { %v780_v38 = vadd.f32 %v779_v3, %v691_v2 }
 0x15a   :  { %v1034_v10 = vmax.f32 %v780_v38, 0.0 }
 0x15b   :  { %v265_v47 = vpop.f32.mrf.mxu0 }
 0x15c   :  { %v266_v55 = vadd.f32 %v265_v47, %v2984_v62  ;;  %v354_v56 = vpop.f32.mrf.mxu1 }
 0x15d   :  { %v355_v58 = vadd.f32 %v354_v56, %v2987_v63  ;;  %v692_v52 = vpop.f32.mrf.mxu2 }
 0x15e   :  { %v422_v41 = vmax.f32 %v266_v55, 0.0  ;;  %v693_v60 = vadd.f32 %v692_v52, %v3179_v34  ;;  %v781_v42 = vpop.f32.mrf.mxu3 }
 0x15f   :  { %v423_v0 = vmax.f32 %v355_v58, 0.0 }
 0x160   :  { %v782_v1 = vadd.f32 %v781_v42, %v693_v60  ;;  %v3238_v4 = vpack.c.bf16 %v422_v41, %v420_v53 }
 0x161   :  { %v3240_v9 = vpack.c.bf16 %v423_v0, %v421_v61  ;;  %v2538_v0 = vld [vmem:[#allocation3 + $0x34] sm:$0xf] }
 0x162   :  { %v1036_v11 = vmax.f32 %v782_v1, 0.0  ;;  %734 = vmatmul.bf16.gmra.mxu2 %v3238_v4  ;;  %v2332_v1 = vld [vmem:[#allocation3 + $0x38] sm:$0xf0] }
 0x163   :  { %823 = vmatmul.bf16.gmra.mxu3 %v3240_v9  ;;  %v268_v13 = vpop.f32.mrf.mxu0 }
 0x164   :  { %v357_v20 = vpop.f32.mrf.mxu1  ;;  %v3244_v21 = vpack.c.bf16 %v1036_v11, %v1034_v10  ;;  %v269_v30 = vadd.f32 %v268_v13, %v2984_v62  ;;  %v2335_v13 = vor.u32 %v2538_v0, %v2332_v1 }
 0x165   :  { %v695_v28 = vpop.f32.mrf.mxu2  ;;  %v358_v35 = vadd.f32 %v357_v20, %v2987_v63 }
 0x166   :  { %v696_v22 = vadd.f32 %v695_v28, %v3179_v34  ;;  %v784_v23 = vpop.f32.mrf.mxu3  ;;  %877 = vmatmul.bf16.gmra.mxu0 %v3126_v15  ;;  %v424_v15 = vmax.f32 %v269_v30, 0.0  ;;  %v2399_v28 = vor.u32 %v2554_v14, %v2396_v17 }
 0x167   :  { %966 = vmatmul.bf16.gmra.mxu1 %v3128_v16  ;;  %v425_v46 = vmax.f32 %v358_v35, 0.0  ;;  %1498 = vmatpush.bf16.msra.mxu0 %v2335_v13 }
 0x168   :  { %v785_v29 = vadd.f32 %v784_v23, %v696_v22  ;;  %1587 = vmatpush.bf16.msra.mxu1 %v2399_v28 }
 0x16a   :  { %v1038_v55 = vmax.f32 %v785_v29, 0.0 }
 0x16b   :  { %v270_v37 = vpop.f32.mrf.mxu0 }
 0x16c   :  { %v271_v2 = vadd.f32 %v270_v37, %v2984_v62  ;;  %v359_v3 = vpop.f32.mrf.mxu1 }
 0x16d   :  { %v360_v38 = vadd.f32 %v359_v3, %v2987_v63  ;;  %v697_v39 = vpop.f32.mrf.mxu2 }
 0x16e   :  { %v426_v40 = vmax.f32 %v271_v2, 0.0  ;;  %v698_v16 = vadd.f32 %v697_v39, %v3179_v34  ;;  %v786_v43 = vpop.f32.mrf.mxu3 }
 0x16f   :  { %v427_v47 = vmax.f32 %v360_v38, 0.0  ;;  %v2571_v38 = vld [vmem:[#allocation6 + $0x38] sm:$0xff] }
 0x170   :  { %v787_v50 = vadd.f32 %v786_v43, %v698_v16  ;;  %v3254_v51 = vpack.c.bf16 %v426_v40, %v424_v15  ;;  %1898 = vmatpush.bf16.msra.mxu2 %v2571_v38 }
 0x171   :  { %v3256_v54 = vpack.c.bf16 %v427_v47, %v425_v46 }
 0x172   :  { %v1040_v56 = vmax.f32 %v787_v50, 0.0  ;;  %739 = vmatmul.bf16.gmra.mxu2 %v3254_v51  ;;  %v2579_v50 = vld [vmem:[#allocation6 + $0x78] sm:$0xff] }
 0x173   :  { %828 = vmatmul.bf16.gmra.mxu3 %v3256_v54  ;;  %v273_v57 = vpop.f32.mrf.mxu0 }
 0x174   :  { %v362_v58 = vpop.f32.mrf.mxu1  ;;  %v3260_v52 = vpack.c.bf16 %v1040_v56, %v1038_v55  ;;  %v274_v61 = vadd.f32 %v273_v57, %v2984_v62  ;;  %1987 = vmatpush.bf16.msra.mxu3 %v2579_v50 }
 0x175   :  { %v700_v53 = vpop.f32.mrf.mxu2  ;;  %v363_v10 = vadd.f32 %v362_v58, %v2987_v63 }
 0x176   :  { %v701_v41 = vadd.f32 %v700_v53, %v3179_v34  ;;  %v789_v60 = vpop.f32.mrf.mxu3  ;;  %882 = vmatmul.bf16.gmra.mxu0 %v3144_v44 }
 0x177   :  { %971 = vmatmul.bf16.gmra.mxu1 %v3146_v45  ;;  %v428_v45 = vmax.f32 %v274_v61, 0.0  ;;  %v429_v29 = vmax.f32 %v363_v10, 0.0 }
 0x178   :  { %v790_v42 = vadd.f32 %v789_v60, %v701_v41 }
 0x17a   :  { %v1042_v2 = vmax.f32 %v790_v42, 0.0 }
 0x17b   :  { %v275_v11 = vpop.f32.mrf.mxu0 }
 0x17c   :  { %v276_v20 = vadd.f32 %v275_v11, %v2984_v62  ;;  %v364_v27 = vpop.f32.mrf.mxu1 }
 0x17d   :  { %v365_v22 = vadd.f32 %v364_v27, %v2987_v63  ;;  %v702_v44 = vpop.f32.mrf.mxu2 }
 0x17e   :  { %v430_v23 = vmax.f32 %v276_v20, 0.0  ;;  %v703_v24 = vadd.f32 %v702_v44, %v3179_v34  ;;  %v791_v25 = vpop.f32.mrf.mxu3 }
 0x17f   :  { %v431_v19 = vmax.f32 %v365_v22, 0.0 }
 0x180   :  { %v792_v30 = vadd.f32 %v791_v25, %v703_v24  ;;  %v3270_v35 = vpack.c.bf16 %v430_v23, %v428_v45  ;;  %v2536_v24 = vld [vmem:[#allocation3 + $0x24] sm:$0xf]  ;;  %v2324_v25 = vld [vmem:[#allocation3 + $0x28] sm:$0xf0] }
 0x181   :  { %v3272_v37 = vpack.c.bf16 %v431_v19, %v429_v29  ;;  %v2327_v19 = vor.u32 %v2536_v24, %v2324_v25 }
 0x182   :  { %v1044_v3 = vmax.f32 %v792_v30, 0.0  ;;  %744 = vmatmul.bf16.gmra.mxu2 %v3270_v35  ;;  %v2388_v30 = vld [vmem:[#allocation3 + $0xa8] sm:$0xf0] }
 0x183   :  { %833 = vmatmul.bf16.gmra.mxu3 %v3272_v37  ;;  %v278_v39 = vpop.f32.mrf.mxu0  ;;  %1499 = vmatpush.bf16.msra.mxu0 %v2327_v19 }
 0x184   :  { %v367_v15 = vpop.f32.mrf.mxu1  ;;  %v3276_v40 = vpack.c.bf16 %v1044_v3, %v1042_v2  ;;  %v279_v55 = vadd.f32 %v278_v39, %v2984_v62 }
 0x185   :  { %v705_v16 = vpop.f32.mrf.mxu2  ;;  %v368_v56 = vadd.f32 %v367_v15, %v2987_v63 }
 0x186   :  { %v706_v43 = vadd.f32 %v705_v16, %v3179_v34  ;;  %v794_v46 = vpop.f32.mrf.mxu3  ;;  %887 = vmatmul.bf16.gmra.mxu0 %v3156_v7  ;;  %v432_v42 = vmax.f32 %v279_v55, 0.0 }
 0x187   :  { %976 = vmatmul.bf16.gmra.mxu1 %v3158_v8  ;;  %v433_v8 = vmax.f32 %v368_v56, 0.0 }
 0x188   :  { %v795_v47 = vadd.f32 %v794_v46, %v706_v43 }
 0x18a   :  { %v1046_v14 = vmax.f32 %v795_v47, 0.0 }
 0x18b   :  { %v280_v57 = vpop.f32.mrf.mxu0 }
 0x18c   :  { %v281_v58 = vadd.f32 %v280_v57, %v2984_v62  ;;  %v369_v53 = vpop.f32.mrf.mxu1  ;;  %v2570_v57 = vld [vmem:[#allocation6 + $0x30] sm:$0xff] }
 0x18d   :  { %v370_v41 = vadd.f32 %v369_v53, %v2987_v63  ;;  %v707_v60 = vpop.f32.mrf.mxu2  ;;  %v3293_v63 = vperm.slane %v3171_v31, 1  ;;  %v2552_v31 = vld [vmem:[#allocation3 + $0xa4] sm:$0xf]  ;;  %1899 = vmatpush.bf16.msra.mxu2 %v2570_v57 }
 0x18e   :  { %v434_v61 = vmax.f32 %v281_v58, 0.0  ;;  %v708_v7 = vadd.f32 %v707_v60, %v3179_v34  ;;  %v796_v0 = vpop.f32.mrf.mxu3  ;;  %v2391_v39 = vor.u32 %v2552_v31, %v2388_v30 }
 0x18f   :  { %v435_v1 = vmax.f32 %v370_v41, 0.0 }
 0x190   :  { %v797_v10 = vadd.f32 %v796_v0, %v708_v7  ;;  %v3286_v11 = vpack.c.bf16 %v434_v61, %v432_v42  ;;  %1588 = vmatpush.bf16.msra.mxu1 %v2391_v39  ;;  %v2534_v39 = vld [vmem:[#allocation3 + $0x14] sm:$0xf] }
 0x191   :  { %v3288_v13 = vpack.c.bf16 %v435_v1, %v433_v8  ;;  %v2578_v8 = vld [vmem:[#allocation6 + $0x70] sm:$0xff] }
 0x192   :  { %v1048_v17 = vmax.f32 %v797_v10, 0.0  ;;  %749 = vmatmul.bf16.gmra.mxu2 %v3286_v11  ;;  %1988 = vmatpush.bf16.msra.mxu3 %v2578_v8  ;;  %v2569_v8 = vld [vmem:[#allocation6 + $0x28] sm:$0xff] }
 0x193   :  { %838 = vmatmul.bf16.gmra.mxu3 %v3288_v13  ;;  %v853_v62 = vpop.f32.mrf.mxu0  ;;  %1900 = vmatpush.bf16.msra.mxu2 %v2569_v8 }
 0x194   :  { %v942_v20 = vpop.f32.mrf.mxu1  ;;  %v3295_v27 = vpack.c.bf16 %v1048_v17, %v1046_v14  ;;  %v854_v45 = vadd.f32 %v853_v62, %v3293_v63 }
 0x195   :  { %v710_v28 = vpop.f32.mrf.mxu2 }
 0x196   :  { %v711_v22 = vadd.f32 %v710_v28, %v3179_v34  ;;  %v799_v44 = vpop.f32.mrf.mxu3  ;;  %892 = vmatmul.bf16.gmra.mxu0 %v3173_v32  ;;  %v943_v2 = vadd.f32 %v942_v20, %v854_v45 }
 0x197   :  { %981 = vmatmul.bf16.gmra.mxu1 %v3175_v33 }
 0x198   :  { %v800_v23 = vadd.f32 %v799_v44, %v711_v22  ;;  %v1023_v43 = vmax.f32 %v943_v2, 0.0 }
 0x19a   :  { %v1050_v50 = vmax.f32 %v800_v23, 0.0 }
 0x19b   :  { %v855_v29 = vpop.f32.mrf.mxu0 }
 0x19c   :  { %v856_v3 = vadd.f32 %v855_v29, %v3293_v63  ;;  %v944_v38 = vpop.f32.mrf.mxu1 }
 0x19d   :  { %v712_v15 = vpop.f32.mrf.mxu2 }
 0x19e   :  { %v945_v16 = vadd.f32 %v944_v38, %v856_v3  ;;  %v713_v32 = vadd.f32 %v712_v15, %v3179_v34  ;;  %v801_v33 = vpop.f32.mrf.mxu3  ;;  %v2316_v15 = vld [vmem:[#allocation3 + $0x18] sm:$0xf0] }
 0x1a0   :  { %v1025_v46 = vmax.f32 %v945_v16, 0.0  ;;  %v802_v47 = vadd.f32 %v801_v33, %v713_v32  ;;  %v2319_v32 = vor.u32 %v2534_v39, %v2316_v15  ;;  %v2550_v33 = vld [vmem:[#allocation3 + $0x94] sm:$0xf] }
 0x1a2   :  { %v3303_v55 = vpack.c.bf16 %v1025_v46, %v1023_v43  ;;  %v1052_v56 = vmax.f32 %v802_v47, 0.0  ;;  %1324 = vmatmul.bf16.vlgmr.msrb.gmra.mxu2 %v3196_v12  ;;  %v2380_v43 = vld [vmem:[#allocation3 + $0x98] sm:$0xf0]  ;;  %1500 = vmatpush.bf16.msra.mxu0 %v2319_v32 }
 0x1a3   :  { %v858_v58 = vpop.f32.mrf.mxu0 }
 0x1a4   :  { %v947_v53 = vpop.f32.mrf.mxu1  ;;  %1413 = vmatmul.bf16.vlgmr.msrb.gmra.mxu3 %v3303_v55  ;;  %v3307_v41 = vpack.c.bf16 %v1052_v56, %v1050_v50  ;;  %v859_v7 = vadd.f32 %v858_v58, %v3293_v63  ;;  %v2383_v56 = vor.u32 %v2550_v33, %v2380_v43 }
 0x1a5   :  { %v715_v60 = vpop.f32.mrf.mxu2 }
 0x1a6   :  { %v716_v42 = vadd.f32 %v715_v60, %v3179_v34  ;;  %v804_v61 = vpop.f32.mrf.mxu3  ;;  %897 = vmatmul.bf16.gmra.mxu0 %v3190_v5  ;;  %v948_v10 = vadd.f32 %v947_v53, %v859_v7  ;;  %1589 = vmatpush.bf16.msra.mxu1 %v2383_v56  ;;  %v2532_v56 = vld [vmem:[#allocation3 + $0x4] sm:$0xf] }
 0x1a7   :  { %986 = vmatmul.bf16.gmra.mxu1 %v3192_v6 }
 0x1a8   :  { %v805_v0 = vadd.f32 %v804_v61, %v716_v42  ;;  %v1027_v44 = vmax.f32 %v948_v10, 0.0 }
 0x1aa   :  { %v1054_v23 = vmax.f32 %v805_v0, 0.0 }
 0x1ab   :  { %v860_v1 = vpop.f32.mrf.mxu0 }
 0x1ac   :  { %v861_v14 = vadd.f32 %v860_v1, %v3293_v63  ;;  %v949_v17 = vpop.f32.mrf.mxu1 }
 0x1ad   :  { %v717_v62 = vpop.f32.mrf.mxu2 }
 0x1ae   :  { %v950_v20 = vadd.f32 %v949_v17, %v861_v14  ;;  %v718_v28 = vadd.f32 %v717_v62, %v3179_v34  ;;  %v806_v22 = vpop.f32.mrf.mxu3 }
 0x1b0   :  { %v1029_v45 = vmax.f32 %v950_v20, 0.0  ;;  %v807_v5 = vadd.f32 %v806_v22, %v718_v28 }
 0x1b2   :  { %v1056_v6 = vmax.f32 %v807_v5, 0.0  ;;  %1329 = vmatmul.bf16.gmra.mxu2 %v3212_v59  ;;  %v3316_v24 = vpack.c.bf16 %v1029_v45, %v1027_v44  ;;  %v2577_v44 = vld [vmem:[#allocation6 + $0x68] sm:$0xff] }
 0x1b3   :  { %v863_v25 = vpop.f32.mrf.mxu0  ;;  %1989 = vmatpush.bf16.msra.mxu3 %v2577_v44  ;;  %v2568_v44 = vld [vmem:[#allocation6 + $0x20] sm:$0xff] }
 0x1b4   :  { %v952_v29 = vpop.f32.mrf.mxu1  ;;  %1418 = vmatmul.bf16.gmra.mxu3 %v3316_v24  ;;  %v3319_v19 = vpack.c.bf16 %v1056_v6, %v1054_v23  ;;  %v864_v3 = vadd.f32 %v863_v25, %v3293_v63  ;;  %1901 = vmatpush.bf16.msra.mxu2 %v2568_v44 }
 0x1b5   :  { %v720_v31 = vpop.f32.mrf.mxu2 }
 0x1b6   :  { %v721_v30 = vadd.f32 %v720_v31, %v3179_v34  ;;  %v809_v2 = vpop.f32.mrf.mxu3  ;;  %902 = vmatmul.bf16.gmra.mxu0 %v3206_v48  ;;  %v953_v46 = vadd.f32 %v952_v29, %v864_v3 }
 0x1b7   :  { %991 = vmatmul.bf16.gmra.mxu1 %v3208_v49 }
 0x1b8   :  { %v810_v38 = vadd.f32 %v809_v2, %v721_v30  ;;  %v1031_v53 = vmax.f32 %v953_v46, 0.0 }
 0x1ba   :  { %v1058_v61 = vmax.f32 %v810_v38, 0.0 }
 0x1bb   :  { %v865_v16 = vpop.f32.mrf.mxu0 }
 0x1bc   :  { %v866_v47 = vadd.f32 %v865_v16, %v3293_v63  ;;  %v954_v50 = vpop.f32.mrf.mxu1 }
 0x1bd   :  { %v722_v57 = vpop.f32.mrf.mxu2 }
 0x1be   :  { %v955_v58 = vadd.f32 %v954_v50, %v866_v47  ;;  %v723_v48 = vadd.f32 %v722_v57, %v3179_v34  ;;  %v811_v49 = vpop.f32.mrf.mxu3  ;;  %v2308_v57 = vld [vmem:[#allocation3 + $0x8] sm:$0xf0] }
 0x1c0   :  { %v1033_v60 = vmax.f32 %v955_v58, 0.0  ;;  %v812_v42 = vadd.f32 %v811_v49, %v723_v48  ;;  %v2311_v48 = vor.u32 %v2532_v56, %v2308_v57  ;;  %v2548_v49 = vld [vmem:[#allocation3 + $0x84] sm:$0xf] }
 0x1c2   :  { %v1060_v7 = vmax.f32 %v812_v42, 0.0  ;;  %1334 = vmatmul.bf16.gmra.mxu2 %v3228_v36  ;;  %v3328_v0 = vpack.c.bf16 %v1033_v60, %v1031_v53  ;;  %v2372_v53 = vld [vmem:[#allocation3 + $0x88] sm:$0xf0]  ;;  %1501 = vmatpush.bf16.msra.mxu0 %v2311_v48 }
 0x1c3   :  { %v868_v1 = vpop.f32.mrf.mxu0 }
 0x1c4   :  { %v957_v10 = vpop.f32.mrf.mxu1  ;;  %1423 = vmatmul.bf16.gmra.mxu3 %v3328_v0  ;;  %v3331_v14 = vpack.c.bf16 %v1060_v7, %v1058_v61  ;;  %v869_v28 = vadd.f32 %v868_v1, %v3293_v63  ;;  %v2375_v7 = vor.u32 %v2548_v49, %v2372_v53 }
 0x1c5   :  { %v725_v17 = vpop.f32.mrf.mxu2 }
 0x1c6   :  { %v726_v62 = vadd.f32 %v725_v17, %v3179_v34  ;;  %v814_v20 = vpop.f32.mrf.mxu3  ;;  %907 = vmatmul.bf16.gmra.mxu0 %v3222_v26  ;;  %v958_v5 = vadd.f32 %v957_v10, %v869_v28  ;;  %1590 = vmatpush.bf16.msra.mxu1 %v2375_v7 }
 0x1c7   :  { %996 = vmatmul.bf16.gmra.mxu1 %v3224_v18 }
 0x1c8   :  { %v815_v22 = vadd.f32 %v814_v20, %v726_v62  ;;  %v1035_v2 = vmax.f32 %v958_v5, 0.0 }
 0x1ca   :  { %v1062_v38 = vmax.f32 %v815_v22, 0.0 }
 0x1cb   :  { %v870_v45 = vpop.f32.mrf.mxu0 }
 0x1cc   :  { %v871_v23 = vadd.f32 %v870_v45, %v3293_v63  ;;  %v959_v6 = vpop.f32.mrf.mxu1 }
 0x1cd   :  { %v727_v25 = vpop.f32.mrf.mxu2 }
 0x1ce   :  { %v960_v29 = vadd.f32 %v959_v6, %v871_v23  ;;  %v728_v31 = vadd.f32 %v727_v25, %v3179_v34  ;;  %v816_v30 = vpop.f32.mrf.mxu3 }
 0x1d0   :  { %v1037_v3 = vmax.f32 %v960_v29, 0.0  ;;  %v817_v26 = vadd.f32 %v816_v30, %v728_v31 }
 0x1d2   :  { %v1064_v18 = vmax.f32 %v817_v26, 0.0  ;;  %1339 = vmatmul.bf16.gmra.mxu2 %v3244_v21  ;;  %v3340_v39 = vpack.c.bf16 %v1037_v3, %v1035_v2  ;;  %v2576_v2 = vld [vmem:[#allocation6 + $0x60] sm:$0xff] }
 0x1d3   :  { %v873_v15 = vpop.f32.mrf.mxu0  ;;  %1990 = vmatpush.bf16.msra.mxu3 %v2576_v2 }
 0x1d4   :  { %v962_v16 = vpop.f32.mrf.mxu1  ;;  %1428 = vmatmul.bf16.gmra.mxu3 %v3340_v39  ;;  %v3343_v32 = vpack.c.bf16 %v1064_v18, %v1062_v38  ;;  %v874_v47 = vadd.f32 %v873_v15, %v3293_v63 }
 0x1d5   :  { %v730_v33 = vpop.f32.mrf.mxu2 }
 0x1d6   :  { %v731_v43 = vadd.f32 %v730_v33, %v3179_v34  ;;  %v819_v46 = vpop.f32.mrf.mxu3  ;;  %912 = vmatmul.bf16.gmra.mxu0 %v3238_v4  ;;  %v963_v60 = vadd.f32 %v962_v16, %v874_v47 }
 0x1d7   :  { %1001 = vmatmul.bf16.gmra.mxu1 %v3240_v9 }
 0x1d8   :  { %v820_v50 = vadd.f32 %v819_v46, %v731_v43  ;;  %v1039_v10 = vmax.f32 %v963_v60, 0.0 }
 0x1da   :  { %v1066_v20 = vmax.f32 %v820_v50, 0.0 }
 0x1db   :  { %v875_v58 = vpop.f32.mrf.mxu0 }
 0x1dc   :  { %v876_v42 = vadd.f32 %v875_v58, %v3293_v63  ;;  %v964_v61 = vpop.f32.mrf.mxu1 }
 0x1dd   :  { %v732_v8 = vpop.f32.mrf.mxu2 }
 0x1de   :  { %v965_v1 = vadd.f32 %v964_v61, %v876_v42  ;;  %v733_v4 = vadd.f32 %v732_v8, %v3179_v34  ;;  %v821_v9 = vpop.f32.mrf.mxu3 }
 0x1e0   :  { %v1041_v17 = vmax.f32 %v965_v1, 0.0  ;;  %v822_v62 = vadd.f32 %v821_v9, %v733_v4 }
 0x1e2   :  { %v1068_v28 = vmax.f32 %v822_v62, 0.0  ;;  %1344 = vmatmul.bf16.gmra.mxu2 %v3260_v52  ;;  %v3352_v22 = vpack.c.bf16 %v1041_v17, %v1039_v10 }
 0x1e3   :  { %v878_v45 = vpop.f32.mrf.mxu0 }
 0x1e4   :  { %v967_v5 = vpop.f32.mrf.mxu1  ;;  %1433 = vmatmul.bf16.gmra.mxu3 %v3352_v22  ;;  %v3355_v23 = vpack.c.bf16 %v1068_v28, %v1066_v20  ;;  %v879_v31 = vadd.f32 %v878_v45, %v3293_v63 }
 0x1e5   :  { %v735_v6 = vpop.f32.mrf.mxu2 }
 0x1e6   :  { %v736_v25 = vadd.f32 %v735_v6, %v3179_v34  ;;  %v824_v29 = vpop.f32.mrf.mxu3  ;;  %917 = vmatmul.bf16.gmra.mxu0 %v3254_v51  ;;  %v968_v26 = vadd.f32 %v967_v5, %v879_v31  ;;  %v2567_v5 = vld [vmem:[#allocation6 + $0x18] sm:$0xff] }
 0x1e7   :  { %1006 = vmatmul.bf16.gmra.mxu1 %v3256_v54  ;;  %1902 = vmatpush.bf16.msra.mxu2 %v2567_v5 }
 0x1e8   :  { %v825_v30 = vadd.f32 %v824_v29, %v736_v25  ;;  %v1043_v46 = vmax.f32 %v968_v26, 0.0 }
 0x1ea   :  { %v1070_v50 = vmax.f32 %v825_v30, 0.0 }
 0x1eb   :  { %v880_v3 = vpop.f32.mrf.mxu0 }
 0x1ec   :  { %v881_v38 = vadd.f32 %v880_v3, %v3293_v63  ;;  %v969_v18 = vpop.f32.mrf.mxu1 }
 0x1ed   :  { %v737_v15 = vpop.f32.mrf.mxu2 }
 0x1ee   :  { %v970_v16 = vadd.f32 %v969_v18, %v881_v38  ;;  %v738_v33 = vadd.f32 %v737_v15, %v3179_v34  ;;  %v826_v43 = vpop.f32.mrf.mxu3  ;;  %v2575_v38 = vld [vmem:[#allocation6 + $0x58] sm:$0xff] }
 0x1ef   :  { %1991 = vmatpush.bf16.msra.mxu3 %v2575_v38 }
 0x1f0   :  { %v1045_v47 = vmax.f32 %v970_v16, 0.0  ;;  %v827_v51 = vadd.f32 %v826_v43, %v738_v33 }
 0x1f2   :  { %v1072_v54 = vmax.f32 %v827_v51, 0.0  ;;  %1349 = vmatmul.bf16.gmra.mxu2 %v3276_v40  ;;  %v3364_v56 = vpack.c.bf16 %v1045_v47, %v1043_v46 }
 0x1f3   :  { %v883_v57 = vpop.f32.mrf.mxu0 }
 0x1f4   :  { %v972_v58 = vpop.f32.mrf.mxu1  ;;  %1438 = vmatmul.bf16.gmra.mxu3 %v3364_v56  ;;  %v3367_v48 = vpack.c.bf16 %v1072_v54, %v1070_v50  ;;  %v884_v42 = vadd.f32 %v883_v57, %v3293_v63 }
 0x1f5   :  { %v740_v49 = vpop.f32.mrf.mxu2 }
 0x1f6   :  { %v741_v53 = vadd.f32 %v740_v49, %v3179_v34  ;;  %v829_v60 = vpop.f32.mrf.mxu3  ;;  %922 = vmatmul.bf16.gmra.mxu0 %v3270_v35  ;;  %v973_v8 = vadd.f32 %v972_v58, %v884_v42 }
 0x1f7   :  { %1011 = vmatmul.bf16.gmra.mxu1 %v3272_v37 }
 0x1f8   :  { %v830_v61 = vadd.f32 %v829_v60, %v741_v53  ;;  %v1047_v20 = vmax.f32 %v973_v8, 0.0 }
 0x1fa   :  { %v1074_v45 = vmax.f32 %v830_v61, 0.0 }
 0x1fb   :  { %v885_v7 = vpop.f32.mrf.mxu0 }
 0x1fc   :  { %v886_v1 = vadd.f32 %v885_v7, %v3293_v63  ;;  %v974_v4 = vpop.f32.mrf.mxu1 }
 0x1fd   :  { %v742_v9 = vpop.f32.mrf.mxu2 }
 0x1fe   :  { %v975_v10 = vadd.f32 %v974_v4, %v886_v1  ;;  %v743_v17 = vadd.f32 %v742_v9, %v3179_v34  ;;  %v831_v62 = vpop.f32.mrf.mxu3 }
 0x200   :  { %v1049_v28 = vmax.f32 %v975_v10, 0.0  ;;  %v832_v44 = vadd.f32 %v831_v62, %v743_v17 }
 0x202   :  { %v1076_v35 = vmax.f32 %v832_v44, 0.0  ;;  %1354 = vmatmul.bf16.gmra.mxu2 %v3295_v27  ;;  %v3376_v37 = vpack.c.bf16 %v1049_v28, %v1047_v20 }
 0x203   :  { %v888_v6 = vpop.f32.mrf.mxu0 }
 0x204   :  { %v977_v25 = vpop.f32.mrf.mxu1  ;;  %1443 = vmatmul.bf16.gmra.mxu3 %v3376_v37  ;;  %v3379_v29 = vpack.c.bf16 %v1076_v35, %v1074_v45  ;;  %v889_v3 = vadd.f32 %v888_v6, %v3293_v63  ;;  %v3402_v45 = vld [vmem:[%s3649_s6] sm:$0x3] }
 0x205   :  { %v745_v31 = vpop.f32.mrf.mxu2 }
 0x206   :  { %v746_v30 = vadd.f32 %v745_v31, %v3179_v34  ;;  %v834_v2 = vpop.f32.mrf.mxu3  ;;  %927 = vmatmul.bf16.gmra.mxu0 %v3286_v11  ;;  %v978_v15 = vadd.f32 %v977_v25, %v889_v3  ;;  %v3408_v31 = vperm.slane %v3402_v45, 0 }
 0x207   :  { %1016 = vmatmul.bf16.gmra.mxu1 %v3288_v13 }
 0x208   :  { %v835_v26 = vadd.f32 %v834_v2, %v746_v30  ;;  %v1051_v50 = vmax.f32 %v978_v15, 0.0  ;;  %v2566_v30 = vld [vmem:[#allocation6 + $0x10] sm:$0xff] }
 0x209   :  { %1903 = vmatpush.bf16.msra.mxu2 %v2566_v30 }
 0x20a   :  { %v1078_v57 = vmax.f32 %v835_v26, 0.0 }
 0x20b   :  { %v890_v18 = vpop.f32.mrf.mxu0 }
 0x20c   :  { %v891_v16 = vadd.f32 %v890_v18, %v3293_v63  ;;  %v979_v33 = vpop.f32.mrf.mxu1 }
 0x20d   :  { %v747_v43 = vpop.f32.mrf.mxu2 }
 0x20e   :  { %v980_v46 = vadd.f32 %v979_v33, %v891_v16  ;;  %v748_v47 = vadd.f32 %v747_v43, %v3179_v34  ;;  %v836_v51 = vpop.f32.mrf.mxu3  ;;  %v2574_v33 = vld [vmem:[#allocation6 + $0x50] sm:$0xff] }
 0x20f   :  { %1992 = vmatpush.bf16.msra.mxu3 %v2574_v33 }
 0x210   :  { %v1053_v54 = vmax.f32 %v980_v46, 0.0  ;;  %v837_v11 = vadd.f32 %v836_v51, %v748_v47 }
 0x212   :  { %v1080_v13 = vmax.f32 %v837_v11, 0.0  ;;  %1359 = vmatmul.bf16.gmra.mxu2 %v3307_v41  ;;  %v3388_v58 = vpack.c.bf16 %v1053_v54, %v1051_v50 }
 0x213   :  { %v893_v49 = vpop.f32.mrf.mxu0 }
 0x214   :  { %v982_v53 = vpop.f32.mrf.mxu1  ;;  %1448 = vmatmul.bf16.gmra.mxu3 %v3388_v58  ;;  %v3391_v60 = vpack.c.bf16 %v1080_v13, %v1078_v57  ;;  %v894_v8 = vadd.f32 %v893_v49, %v3293_v63 }
 0x215   :  { %v750_v42 = vpop.f32.mrf.mxu2 }
 0x216   :  { %v751_v61 = vadd.f32 %v750_v42, %v3179_v34  ;;  %v839_v7 = vpop.f32.mrf.mxu3  ;;  %1502 = vmatmul.bf16.vlgmr.msra.gmra.mxu0 %v3196_v12  ;;  %v983_v9 = vadd.f32 %v982_v53, %v894_v8 }
 0x217   :  { %1591 = vmatmul.bf16.vlgmr.msra.gmra.mxu1 %v3303_v55 }
 0x218   :  { %v840_v1 = vadd.f32 %v839_v7, %v751_v61  ;;  %v1055_v12 = vmax.f32 %v983_v9, 0.0 }
 0x21a   :  { %v1082_v5 = vmax.f32 %v840_v1, 0.0 }
 0x21b   :  { %v895_v4 = vpop.f32.mrf.mxu0 }
 0x21c   :  { %v896_v10 = vadd.f32 %v895_v4, %v3293_v63  ;;  %v984_v17 = vpop.f32.mrf.mxu1 }
 0x21d   :  { %v752_v62 = vpop.f32.mrf.mxu2 }
 0x21e   :  { %v985_v20 = vadd.f32 %v984_v17, %v896_v10  ;;  %v753_v28 = vadd.f32 %v752_v62, %v3179_v34  ;;  %v841_v44 = vpop.f32.mrf.mxu3 }
 0x220   :  { %v1057_v55 = vmax.f32 %v985_v20, 0.0  ;;  %v842_v35 = vadd.f32 %v841_v44, %v753_v28 }
 0x222   :  { %v1084_v6 = vmax.f32 %v842_v35, 0.0  ;;  %1364 = vmatmul.bf16.gmra.mxu2 %v3319_v19  ;;  %v3405_v25 = vpack.c.bf16 %v1057_v55, %v1055_v12 }
 0x223   :  { %v898_v34 = vpop.f32.mrf.mxu0 }
 0x224   :  { %v987_v2 = vpop.f32.mrf.mxu1  ;;  %1453 = vmatmul.bf16.gmra.mxu3 %v3405_v25  ;;  %v3411_v3 = vpack.c.bf16 %v1084_v6, %v1082_v5  ;;  %v899_v15 = vadd.f32 %v898_v34, %v3293_v63 }
 0x225   :  { %v1325_v26 = vpop.f32.mrf.mxu2 }
 0x226   :  { %v1326_v38 = vadd.f32 %v1325_v26, %v3408_v31  ;;  %1507 = vmatmul.bf16.gmra.mxu0 %v3212_v59  ;;  %v988_v46 = vadd.f32 %v987_v2, %v899_v15  ;;  %v2565_v26 = vld [vmem:[#allocation6 + $0x8] sm:$0xff] }
 0x227   :  { %1596 = vmatmul.bf16.gmra.mxu1 %v3316_v24  ;;  %v1414_v18 = vpop.f32.mrf.mxu3  ;;  %1904 = vmatpush.bf16.msra.mxu2 %v2565_v26 }
 0x228   :  { %v1415_v16 = vadd.f32 %v1414_v18, %v1326_v38  ;;  %v1059_v13 = vmax.f32 %v988_v46, 0.0 }
 0x22a   :  { %v1672_v24 = vmax.f32 %v1415_v16, 0.0 }
 0x22b   :  { %v900_v43 = vpop.f32.mrf.mxu0 }
 0x22c   :  { %v901_v47 = vadd.f32 %v900_v43, %v3293_v63  ;;  %v989_v51 = vpop.f32.mrf.mxu1 }
 0x22d   :  { %v1327_v50 = vpop.f32.mrf.mxu2 }
 0x22e   :  { %v990_v54 = vadd.f32 %v989_v51, %v901_v47  ;;  %v1328_v11 = vadd.f32 %v1327_v50, %v3408_v31  ;;  %v2573_v51 = vld [vmem:[#allocation6 + $0x48] sm:$0xff] }
 0x22f   :  { %v1416_v57 = vpop.f32.mrf.mxu3  ;;  %1993 = vmatpush.bf16.msra.mxu3 %v2573_v51 }
 0x230   :  { %v1061_v59 = vmax.f32 %v990_v54, 0.0  ;;  %v1417_v49 = vadd.f32 %v1416_v57, %v1328_v11 }
 0x232   :  { %v1674_v53 = vmax.f32 %v1417_v49, 0.0  ;;  %1369 = vmatmul.bf16.gmra.mxu2 %v3331_v14  ;;  %v3420_v42 = vpack.c.bf16 %v1061_v59, %v1059_v13 }
 0x233   :  { %v903_v61 = vpop.f32.mrf.mxu0 }
 0x234   :  { %v3422_v7 = vpack.c.bf16 %v1674_v53, %v1672_v24  ;;  %v992_v8 = vpop.f32.mrf.mxu1  ;;  %1458 = vmatmul.bf16.gmra.mxu3 %v3420_v42  ;;  %v904_v10 = vadd.f32 %v903_v61, %v3293_v63 }
 0x235   :  { %v1330_v1 = vpop.f32.mrf.mxu2 }
 0x236   :  { %v1331_v4 = vadd.f32 %v1330_v1, %v3408_v31  ;;  %1512 = vmatmul.bf16.gmra.mxu0 %v3228_v36  ;;  %v993_v20 = vadd.f32 %v992_v8, %v904_v10 }
 0x237   :  { %1601 = vmatmul.bf16.gmra.mxu1 %v3328_v0  ;;  %v1419_v9 = vpop.f32.mrf.mxu3 }
 0x238   :  { %v1420_v17 = vadd.f32 %v1419_v9, %v1331_v4  ;;  %v1063_v6 = vmax.f32 %v993_v20, 0.0 }
 0x23a   :  { %v1676_v36 = vmax.f32 %v1420_v17, 0.0 }
 0x23b   :  { %v905_v62 = vpop.f32.mrf.mxu0 }
 0x23c   :  { %v906_v28 = vadd.f32 %v905_v62, %v3293_v63  ;;  %v994_v44 = vpop.f32.mrf.mxu1 }
 0x23d   :  { %v1332_v12 = vpop.f32.mrf.mxu2 }
 0x23e   :  { %v995_v55 = vadd.f32 %v994_v44, %v906_v28  ;;  %v1333_v35 = vadd.f32 %v1332_v12, %v3408_v31 }
 0x23f   :  { %v1421_v5 = vpop.f32.mrf.mxu3 }
 0x240   :  { %v1065_v30 = vmax.f32 %v995_v55, 0.0  ;;  %v1422_v34 = vadd.f32 %v1421_v5, %v1333_v35 }
 0x242   :  { %v1678_v2 = vmax.f32 %v1422_v34, 0.0  ;;  %1374 = vmatmul.bf16.gmra.mxu2 %v3343_v32  ;;  %v3432_v0 = vpack.c.bf16 %v1065_v30, %v1063_v6 }
 0x243   :  { %v908_v38 = vpop.f32.mrf.mxu0 }
 0x244   :  { %v997_v18 = vpop.f32.mrf.mxu1  ;;  %1463 = vmatmul.bf16.gmra.mxu3 %v3432_v0  ;;  %v3435_v15 = vpack.c.bf16 %v1678_v2, %v1676_v36  ;;  %v909_v46 = vadd.f32 %v908_v38, %v3293_v63 }
 0x245   :  { %v1335_v16 = vpop.f32.mrf.mxu2 }
 0x246   :  { %v1336_v33 = vadd.f32 %v1335_v16, %v3408_v31  ;;  %1517 = vmatmul.bf16.gmra.mxu0 %v3244_v21  ;;  %v998_v54 = vadd.f32 %v997_v18, %v909_v46  ;;  %v2564_v16 = vld [vmem:[#allocation6] sm:$0xff] }
 0x247   :  { %1606 = vmatmul.bf16.gmra.mxu1 %v3340_v39  ;;  %v1424_v43 = vpop.f32.mrf.mxu3  ;;  %1905 = vmatpush.bf16.msra.mxu2 %v2564_v16 }
 0x248   :  { %v1425_v47 = vadd.f32 %v1424_v43, %v1336_v33  ;;  %v1067_v53 = vmax.f32 %v998_v54, 0.0 }
 0x24a   :  { %v1680_v39 = vmax.f32 %v1425_v47, 0.0 }
 0x24b   :  { %v910_v50 = vpop.f32.mrf.mxu0 }
 0x24c   :  { %v911_v11 = vadd.f32 %v910_v50, %v3293_v63  ;;  %v999_v57 = vpop.f32.mrf.mxu1 }
 0x24d   :  { %v1337_v13 = vpop.f32.mrf.mxu2 }
 0x24e   :  { %v1000_v59 = vadd.f32 %v999_v57, %v911_v11  ;;  %v1338_v49 = vadd.f32 %v1337_v13, %v3408_v31  ;;  %v2572_v57 = vld [vmem:[#allocation6 + $0x40] sm:$0xff] }
 0x24f   :  { %v1426_v24 = vpop.f32.mrf.mxu3  ;;  %1994 = vmatpush.bf16.msra.mxu3 %v2572_v57 }
 0x250   :  { %v1069_v21 = vmax.f32 %v1000_v59, 0.0  ;;  %v1427_v61 = vadd.f32 %v1426_v24, %v1338_v49 }
 0x252   :  { %v1682_v8 = vmax.f32 %v1427_v61, 0.0  ;;  %1379 = vmatmul.bf16.gmra.mxu2 %v3355_v23  ;;  %v3444_v1 = vpack.c.bf16 %v1069_v21, %v1067_v53 }
 0x253   :  { %v913_v4 = vpop.f32.mrf.mxu0 }
 0x254   :  { %v1002_v9 = vpop.f32.mrf.mxu1  ;;  %1468 = vmatmul.bf16.gmra.mxu3 %v3444_v1  ;;  %v3447_v10 = vpack.c.bf16 %v1682_v8, %v1680_v39  ;;  %v914_v28 = vadd.f32 %v913_v4, %v3293_v63 }
 0x255   :  { %v1340_v17 = vpop.f32.mrf.mxu2 }
 0x256   :  { %v1341_v62 = vadd.f32 %v1340_v17, %v3408_v31  ;;  %1522 = vmatmul.bf16.gmra.mxu0 %v3260_v52  ;;  %v1003_v55 = vadd.f32 %v1002_v9, %v914_v28 }
 0x257   :  { %1611 = vmatmul.bf16.gmra.mxu1 %v3352_v22  ;;  %v1429_v20 = vpop.f32.mrf.mxu3 }
 0x258   :  { %v1430_v44 = vadd.f32 %v1429_v20, %v1341_v62  ;;  %v1071_v2 = vmax.f32 %v1003_v55, 0.0 }
 0x25a   :  { %v1684_v52 = vmax.f32 %v1430_v44, 0.0 }
 0x25b   :  { %v915_v12 = vpop.f32.mrf.mxu0 }
 0x25c   :  { %v916_v35 = vadd.f32 %v915_v12, %v3293_v63  ;;  %v1004_v5 = vpop.f32.mrf.mxu1 }
 0x25d   :  { %v1342_v6 = vpop.f32.mrf.mxu2 }
 0x25e   :  { %v1005_v30 = vadd.f32 %v1004_v5, %v916_v35  ;;  %v1343_v34 = vadd.f32 %v1342_v6, %v3408_v31 }
 0x25f   :  { %v1431_v36 = vpop.f32.mrf.mxu3 }
 0x260   :  { %v1073_v26 = vmax.f32 %v1005_v30, 0.0  ;;  %v1432_v38 = vadd.f32 %v1431_v36, %v1343_v34 }
 0x262   :  { %v1686_v18 = vmax.f32 %v1432_v38, 0.0  ;;  %1384 = vmatmul.bf16.gmra.mxu2 %v3367_v48  ;;  %v3456_v22 = vpack.c.bf16 %v1073_v26, %v1071_v2 }
 0x263   :  { %v918_v33 = vpop.f32.mrf.mxu0 }
 0x264   :  { %v1007_v43 = vpop.f32.mrf.mxu1  ;;  %1473 = vmatmul.bf16.gmra.mxu3 %v3456_v22  ;;  %v3459_v46 = vpack.c.bf16 %v1686_v18, %v1684_v52  ;;  %v919_v54 = vadd.f32 %v918_v33, %v3293_v63 }
 0x265   :  { %v1345_v47 = vpop.f32.mrf.mxu2 }
 0x266   :  { %v1346_v51 = vadd.f32 %v1345_v47, %v3408_v31  ;;  %1527 = vmatmul.bf16.gmra.mxu0 %v3276_v40  ;;  %v1008_v59 = vadd.f32 %v1007_v43, %v919_v54 }
 0x267   :  { %1616 = vmatmul.bf16.gmra.mxu1 %v3364_v56  ;;  %v1434_v50 = vpop.f32.mrf.mxu3 }
 0x268   :  { %v1435_v11 = vadd.f32 %v1434_v50, %v1346_v51  ;;  %v1075_v8 = vmax.f32 %v1008_v59, 0.0 }
 0x26a   :  { %v1688_v56 = vmax.f32 %v1435_v11, 0.0 }
 0x26b   :  { %v920_v13 = vpop.f32.mrf.mxu0 }
 0x26c   :  { %v921_v49 = vadd.f32 %v920_v13, %v3293_v63  ;;  %v1009_v24 = vpop.f32.mrf.mxu1 }
 0x26d   :  { %v1347_v53 = vpop.f32.mrf.mxu2 }
 0x26e   :  { %v1010_v21 = vadd.f32 %v1009_v24, %v921_v49  ;;  %v1348_v61 = vadd.f32 %v1347_v53, %v3408_v31 }
 0x26f   :  { %v1436_v39 = vpop.f32.mrf.mxu3 }
 0x270   :  { %v1077_v40 = vmax.f32 %v1010_v21, 0.0  ;;  %v1437_v4 = vadd.f32 %v1436_v39, %v1348_v61 }
 0x272   :  { %v1690_v9 = vmax.f32 %v1437_v4, 0.0  ;;  %1389 = vmatmul.bf16.gmra.mxu2 %v3379_v29  ;;  %v3468_v17 = vpack.c.bf16 %v1077_v40, %v1075_v8 }
 0x273   :  { %v923_v62 = vpop.f32.mrf.mxu0 }
 0x274   :  { %v1012_v20 = vpop.f32.mrf.mxu1  ;;  %1478 = vmatmul.bf16.gmra.mxu3 %v3468_v17  ;;  %v3471_v28 = vpack.c.bf16 %v1690_v9, %v1688_v56  ;;  %v924_v35 = vadd.f32 %v923_v62, %v3293_v63 }
 0x275   :  { %v1350_v44 = vpop.f32.mrf.mxu2 }
 0x276   :  { %v1351_v12 = vadd.f32 %v1350_v44, %v3408_v31  ;;  %1532 = vmatmul.bf16.gmra.mxu0 %v3295_v27  ;;  %v1013_v30 = vadd.f32 %v1012_v20, %v924_v35  ;;  %v3495_v44 = vperm.slane %v3402_v45, 1 }
 0x277   :  { %1621 = vmatmul.bf16.gmra.mxu1 %v3376_v37  ;;  %v1439_v55 = vpop.f32.mrf.mxu3 }
 0x278   :  { %v1440_v5 = vadd.f32 %v1439_v55, %v1351_v12  ;;  %v1079_v18 = vmax.f32 %v1013_v30, 0.0 }
 0x27a   :  { %v1692_v27 = vmax.f32 %v1440_v5, 0.0 }
 0x27b   :  { %v925_v6 = vpop.f32.mrf.mxu0 }
 0x27c   :  { %v926_v34 = vadd.f32 %v925_v6, %v3293_v63  ;;  %v1014_v36 = vpop.f32.mrf.mxu1 }
 0x27d   :  { %v1352_v2 = vpop.f32.mrf.mxu2 }
 0x27e   :  { %v1015_v26 = vadd.f32 %v1014_v36, %v926_v34  ;;  %v1353_v38 = vadd.f32 %v1352_v2, %v3408_v31 }
 0x27f   :  { %v1441_v52 = vpop.f32.mrf.mxu3 }
 0x280   :  { %v1081_v16 = vmax.f32 %v1015_v26, 0.0  ;;  %v1442_v33 = vadd.f32 %v1441_v52, %v1353_v38 }
 0x282   :  { %v1694_v43 = vmax.f32 %v1442_v33, 0.0  ;;  %1394 = vmatmul.bf16.gmra.mxu2 %v3391_v60  ;;  %v3480_v37 = vpack.c.bf16 %v1081_v16, %v1079_v18 }
 0x283   :  { %v928_v47 = vpop.f32.mrf.mxu0 }
 0x284   :  { %v1017_v51 = vpop.f32.mrf.mxu1  ;;  %1483 = vmatmul.bf16.gmra.mxu3 %v3480_v37  ;;  %v3483_v50 = vpack.c.bf16 %v1694_v43, %v1692_v27  ;;  %v929_v13 = vadd.f32 %v928_v47, %v3293_v63 }
 0x285   :  { %v1355_v54 = vpop.f32.mrf.mxu2 }
 0x286   :  { %v1356_v11 = vadd.f32 %v1355_v54, %v3408_v31  ;;  %1537 = vmatmul.bf16.gmra.mxu0 %v3307_v41  ;;  %v1018_v24 = vadd.f32 %v1017_v51, %v929_v13 }
 0x287   :  { %1626 = vmatmul.bf16.gmra.mxu1 %v3388_v58  ;;  %v1444_v57 = vpop.f32.mrf.mxu3 }
 0x288   :  { %v1445_v59 = vadd.f32 %v1444_v57, %v1356_v11  ;;  %v1083_v4 = vmax.f32 %v1018_v24, 0.0 }
 0x28a   :  { %v1696_v41 = vmax.f32 %v1445_v59, 0.0 }
 0x28b   :  { %v930_v49 = vpop.f32.mrf.mxu0 }
 0x28c   :  { %v931_v53 = vadd.f32 %v930_v49, %v3293_v63  ;;  %v1019_v21 = vpop.f32.mrf.mxu1 }
 0x28d   :  { %v1357_v61 = vpop.f32.mrf.mxu2 }
 0x28e   :  { %v1020_v39 = vadd.f32 %v1019_v21, %v931_v53  ;;  %v1358_v8 = vadd.f32 %v1357_v61, %v3408_v31 }
 0x28f   :  { %v1446_v40 = vpop.f32.mrf.mxu3 }
 0x290   :  { %v1085_v56 = vmax.f32 %v1020_v39, 0.0  ;;  %v1447_v9 = vadd.f32 %v1446_v40, %v1358_v8 }
 0x292   :  { %v1698_v62 = vmax.f32 %v1447_v9, 0.0  ;;  %1399 = vmatmul.bf16.gmra.mxu2 %v3411_v3  ;;  %v3492_v58 = vpack.c.bf16 %v1085_v56, %v1083_v4 }
 0x293   :  { %v1503_v20 = vpop.f32.mrf.mxu0 }
 0x294   :  { %v1592_v63 = vpop.f32.mrf.mxu1  ;;  %1488 = vmatmul.bf16.gmra.mxu3 %v3492_v58  ;;  %v3498_v12 = vpack.c.bf16 %v1698_v62, %v1696_v41  ;;  %v1504_v6 = vadd.f32 %v1503_v20, %v3495_v44 }
 0x295   :  { %v1360_v55 = vpop.f32.mrf.mxu2 }
 0x296   :  { %v1361_v35 = vadd.f32 %v1360_v55, %v3408_v31  ;;  %1542 = vmatmul.bf16.gmra.mxu0 %v3319_v19  ;;  %v1593_v36 = vadd.f32 %v1592_v63, %v1504_v6 }
 0x297   :  { %1631 = vmatmul.bf16.gmra.mxu1 %v3405_v25  ;;  %v1449_v5 = vpop.f32.mrf.mxu3 }
 0x298   :  { %v1450_v30 = vadd.f32 %v1449_v5, %v1361_v35  ;;  %v1673_v16 = vmax.f32 %v1593_v36, 0.0 }
 0x29a   :  { %v1700_v19 = vmax.f32 %v1450_v30, 0.0 }
 0x29b   :  { %v1505_v34 = vpop.f32.mrf.mxu0 }
 0x29c   :  { %v1506_v45 = vadd.f32 %v1505_v34, %v3495_v44  ;;  %v1594_v2 = vpop.f32.mrf.mxu1 }
 0x29d   :  { %v1362_v26 = vpop.f32.mrf.mxu2 }
 0x29e   :  { %v1595_v38 = vadd.f32 %v1594_v2, %v1506_v45  ;;  %v1363_v52 = vadd.f32 %v1362_v26, %v3408_v31 }
 0x29f   :  { %v1451_v18 = vpop.f32.mrf.mxu3 }
 0x2a0   :  { %v1675_v33 = vmax.f32 %v1595_v38, 0.0  ;;  %v1452_v27 = vadd.f32 %v1451_v18, %v1363_v52 }
 0x2a2   :  { %v1737_v43 = vpack.c.bf16 %v1675_v33, %v1673_v16  ;;  %v1702_v25 = vmax.f32 %v1452_v27, 0.0  ;;  %1906 = vmatmul.bf16.vlgmr.msra.gmra.mxu2 %v3422_v7 }
 0x2a3   :  { %v1508_v47 = vpop.f32.mrf.mxu0 }
 0x2a4   :  { %v1597_v51 = vpop.f32.mrf.mxu1  ;;  %1995 = vmatmul.bf16.vlgmr.msra.gmra.mxu3 %v1737_v43  ;;  %v3507_v54 = vpack.c.bf16 %v1702_v25, %v1700_v19  ;;  %v1509_v59 = vadd.f32 %v1508_v47, %v3495_v44 }
 0x2a5   :  { %v1365_v11 = vpop.f32.mrf.mxu2 }
 0x2a6   :  { %v1366_v57 = vadd.f32 %v1365_v11, %v3408_v31  ;;  %1547 = vmatmul.bf16.gmra.mxu0 %v3331_v14  ;;  %v1598_v53 = vadd.f32 %v1597_v51, %v1509_v59 }
 0x2a7   :  { %1636 = vmatmul.bf16.gmra.mxu1 %v3420_v42  ;;  %v1454_v13 = vpop.f32.mrf.mxu3 }
 0x2a8   :  { %v1455_v49 = vadd.f32 %v1454_v13, %v1366_v57  ;;  %v1677_v4 = vmax.f32 %v1598_v53, 0.0 }
 0x2aa   :  { %v1704_v14 = vmax.f32 %v1455_v49, 0.0 }
 0x2ab   :  { %v1510_v24 = vpop.f32.mrf.mxu0 }
 0x2ac   :  { %v1511_v7 = vadd.f32 %v1510_v24, %v3495_v44  ;;  %v1599_v21 = vpop.f32.mrf.mxu1 }
 0x2ad   :  { %v1367_v61 = vpop.f32.mrf.mxu2 }
 0x2ae   :  { %v1600_v39 = vadd.f32 %v1599_v21, %v1511_v7  ;;  %v1368_v8 = vadd.f32 %v1367_v61, %v3408_v31 }
 0x2af   :  { %v1456_v40 = vpop.f32.mrf.mxu3 }
 0x2b0   :  { %v1679_v56 = vmax.f32 %v1600_v39, 0.0  ;;  %v1457_v9 = vadd.f32 %v1456_v40, %v1368_v8 }
 0x2b2   :  { %v1706_v41 = vmax.f32 %v1457_v9, 0.0  ;;  %1911 = vmatmul.bf16.gmra.mxu2 %v3435_v15  ;;  %v1739_v42 = vpack.c.bf16 %v1679_v56, %v1677_v4 }
 0x2b3   :  { %v1513_v62 = vpop.f32.mrf.mxu0 }
 0x2b4   :  { %v1602_v20 = vpop.f32.mrf.mxu1  ;;  %2000 = vmatmul.bf16.gmra.mxu3 %v1739_v42  ;;  %v3516_v63 = vpack.c.bf16 %v1706_v41, %v1704_v14  ;;  %v1514_v6 = vadd.f32 %v1513_v62, %v3495_v44 }
 0x2b5   :  { %v1370_v55 = vpop.f32.mrf.mxu2 }
 0x2b6   :  { %v1371_v35 = vadd.f32 %v1370_v55, %v3408_v31  ;;  %1552 = vmatmul.bf16.gmra.mxu0 %v3343_v32  ;;  %v1603_v36 = vadd.f32 %v1602_v20, %v1514_v6 }
 0x2b7   :  { %1641 = vmatmul.bf16.gmra.mxu1 %v3432_v0  ;;  %v1459_v5 = vpop.f32.mrf.mxu3 }
 0x2b8   :  { %v1460_v30 = vadd.f32 %v1459_v5, %v1371_v35  ;;  %v1681_v18 = vmax.f32 %v1603_v36, 0.0 }
 0x2ba   :  { %v1708_v32 = vmax.f32 %v1460_v30, 0.0 }
 0x2bb   :  { %v1515_v34 = vpop.f32.mrf.mxu0 }
 0x2bc   :  { %v1516_v15 = vadd.f32 %v1515_v34, %v3495_v44  ;;  %v1604_v45 = vpop.f32.mrf.mxu1 }
 0x2bd   :  { %v1372_v2 = vpop.f32.mrf.mxu2 }
 0x2be   :  { %v1605_v26 = vadd.f32 %v1604_v45, %v1516_v15  ;;  %v1373_v38 = vadd.f32 %v1372_v2, %v3408_v31 }
 0x2bf   :  { %v1461_v52 = vpop.f32.mrf.mxu3 }
 0x2c0   :  { %v1683_v16 = vmax.f32 %v1605_v26, 0.0  ;;  %v1462_v33 = vadd.f32 %v1461_v52, %v1373_v38 }
 0x2c2   :  { %v1710_v27 = vmax.f32 %v1462_v33, 0.0  ;;  %1916 = vmatmul.bf16.gmra.mxu2 %v3447_v10  ;;  %v1741_v0 = vpack.c.bf16 %v1683_v16, %v1681_v18 }
 0x2c3   :  { %v1518_v19 = vpop.f32.mrf.mxu0 }
 0x2c4   :  { %v1607_v43 = vpop.f32.mrf.mxu1  ;;  %2005 = vmatmul.bf16.gmra.mxu3 %v1741_v0  ;;  %v3525_v25 = vpack.c.bf16 %v1710_v27, %v1708_v32  ;;  %v1519_v57 = vadd.f32 %v1518_v19, %v3495_v44 }
 0x2c5   :  { %v1375_v47 = vpop.f32.mrf.mxu2 }
 0x2c6   :  { %v1376_v51 = vadd.f32 %v1375_v47, %v3408_v31  ;;  %1557 = vmatmul.bf16.gmra.mxu0 %v3355_v23  ;;  %v1608_v49 = vadd.f32 %v1607_v43, %v1519_v57 }
 0x2c7   :  { %1646 = vmatmul.bf16.gmra.mxu1 %v3444_v1  ;;  %v1464_v11 = vpop.f32.mrf.mxu3 }
 0x2c8   :  { %v1465_v13 = vadd.f32 %v1464_v11, %v1376_v51  ;;  %v1685_v39 = vmax.f32 %v1608_v49, 0.0 }
 0x2ca   :  { %v1712_v23 = vmax.f32 %v1465_v13, 0.0 }
 0x2cb   :  { %v1520_v59 = vpop.f32.mrf.mxu0 }
 0x2cc   :  { %v1521_v10 = vadd.f32 %v1520_v59, %v3495_v44  ;;  %v1609_v24 = vpop.f32.mrf.mxu1 }
 0x2cd   :  { %v1377_v53 = vpop.f32.mrf.mxu2 }
 0x2ce   :  { %v1610_v7 = vadd.f32 %v1609_v24, %v1521_v10  ;;  %v1378_v21 = vadd.f32 %v1377_v53, %v3408_v31 }
 0x2cf   :  { %v1466_v61 = vpop.f32.mrf.mxu3 }
 0x2d0   :  { %v1687_v8 = vmax.f32 %v1610_v7, 0.0  ;;  %v1467_v40 = vadd.f32 %v1466_v61, %v1378_v21 }
 0x2d2   :  { %v1714_v4 = vmax.f32 %v1467_v40, 0.0  ;;  %1921 = vmatmul.bf16.gmra.mxu2 %v3459_v46  ;;  %v1743_v1 = vpack.c.bf16 %v1687_v8, %v1685_v39 }
 0x2d3   :  { %v1523_v56 = vpop.f32.mrf.mxu0 }
 0x2d4   :  { %v1612_v9 = vpop.f32.mrf.mxu1  ;;  %2010 = vmatmul.bf16.gmra.mxu3 %v1743_v1  ;;  %v3534_v14 = vpack.c.bf16 %v1714_v4, %v1712_v23  ;;  %v1524_v20 = vadd.f32 %v1523_v56, %v3495_v44 }
 0x2d5   :  { %v1380_v41 = vpop.f32.mrf.mxu2 }
 0x2d6   :  { %v1381_v42 = vadd.f32 %v1380_v41, %v3408_v31  ;;  %1562 = vmatmul.bf16.gmra.mxu0 %v3367_v48  ;;  %v1613_v5 = vadd.f32 %v1612_v9, %v1524_v20 }
 0x2d7   :  { %1651 = vmatmul.bf16.gmra.mxu1 %v3456_v22  ;;  %v1469_v62 = vpop.f32.mrf.mxu3 }
 0x2d8   :  { %v1470_v55 = vadd.f32 %v1469_v62, %v1381_v42  ;;  %v1689_v45 = vmax.f32 %v1613_v5, 0.0 }
 0x2da   :  { %v1716_v48 = vmax.f32 %v1470_v55, 0.0 }
 0x2db   :  { %v1525_v35 = vpop.f32.mrf.mxu0 }
 0x2dc   :  { %v1526_v46 = vadd.f32 %v1525_v35, %v3495_v44  ;;  %v1614_v6 = vpop.f32.mrf.mxu1 }
 0x2dd   :  { %v1382_v30 = vpop.f32.mrf.mxu2 }
 0x2de   :  { %v1615_v34 = vadd.f32 %v1614_v6, %v1526_v46  ;;  %v1383_v36 = vadd.f32 %v1382_v30, %v3408_v31 }
 0x2df   :  { %v1471_v15 = vpop.f32.mrf.mxu3 }
 0x2e0   :  { %v1691_v2 = vmax.f32 %v1615_v34, 0.0  ;;  %v1472_v26 = vadd.f32 %v1471_v15, %v1383_v36 }
 0x2e2   :  { %v1745_v38 = vpack.c.bf16 %v1691_v2, %v1689_v45  ;;  %v1718_v22 = vmax.f32 %v1472_v26, 0.0  ;;  %1926 = vmatmul.bf16.gmra.mxu2 %v3471_v28 }
 0x2e3   :  { %v1528_v52 = vpop.f32.mrf.mxu0 }
 0x2e4   :  { %v1617_v18 = vpop.f32.mrf.mxu1  ;;  %2015 = vmatmul.bf16.gmra.mxu3 %v1745_v38  ;;  %v3543_v16 = vpack.c.bf16 %v1718_v22, %v1716_v48  ;;  %v1529_v0 = vadd.f32 %v1528_v52, %v3495_v44 }
 0x2e5   :  { %v1385_v33 = vpop.f32.mrf.mxu2 }
 0x2e6   :  { %v1386_v32 = vadd.f32 %v1385_v33, %v3408_v31  ;;  %1567 = vmatmul.bf16.gmra.mxu0 %v3379_v29  ;;  %v1618_v47 = vadd.f32 %v1617_v18, %v1529_v0 }
 0x2e7   :  { %1656 = vmatmul.bf16.gmra.mxu1 %v3468_v17  ;;  %v1474_v27 = vpop.f32.mrf.mxu3 }
 0x2e8   :  { %v1475_v19 = vadd.f32 %v1474_v27, %v1386_v32  ;;  %v1693_v49 = vmax.f32 %v1618_v47, 0.0 }
 0x2ea   :  { %v1720_v29 = vmax.f32 %v1475_v19, 0.0 }
 0x2eb   :  { %v1530_v43 = vpop.f32.mrf.mxu0 }
 0x2ec   :  { %v1531_v28 = vadd.f32 %v1530_v43, %v3495_v44  ;;  %v1619_v51 = vpop.f32.mrf.mxu1 }
 0x2ed   :  { %v1387_v11 = vpop.f32.mrf.mxu2 }
 0x2ee   :  { %v1620_v57 = vadd.f32 %v1619_v51, %v1531_v28  ;;  %v1388_v13 = vadd.f32 %v1387_v11, %v3408_v31 }
 0x2ef   :  { %v1476_v59 = vpop.f32.mrf.mxu3 }
 0x2f0   :  { %v1695_v10 = vmax.f32 %v1620_v57, 0.0  ;;  %v1477_v24 = vadd.f32 %v1476_v59, %v1388_v13 }
 0x2f2   :  { %v1747_v53 = vpack.c.bf16 %v1695_v10, %v1693_v49  ;;  %v1722_v17 = vmax.f32 %v1477_v24, 0.0  ;;  %1931 = vmatmul.bf16.gmra.mxu2 %v3483_v50 }
 0x2f3   :  { %v1533_v7 = vpop.f32.mrf.mxu0 }
 0x2f4   :  { %v1622_v21 = vpop.f32.mrf.mxu1  ;;  %2020 = vmatmul.bf16.gmra.mxu3 %v1747_v53  ;;  %v3552_v61 = vpack.c.bf16 %v1722_v17, %v1720_v29  ;;  %v1534_v23 = vadd.f32 %v1533_v7, %v3495_v44 }
 0x2f5   :  { %v1390_v39 = vpop.f32.mrf.mxu2 }
 0x2f6   :  { %v1391_v8 = vadd.f32 %v1390_v39, %v3408_v31  ;;  %1572 = vmatmul.bf16.gmra.mxu0 %v3391_v60  ;;  %v1623_v56 = vadd.f32 %v1622_v21, %v1534_v23 }
 0x2f7   :  { %1661 = vmatmul.bf16.gmra.mxu1 %v3480_v37  ;;  %v1479_v40 = vpop.f32.mrf.mxu3 }
 0x2f8   :  { %v1480_v4 = vadd.f32 %v1479_v40, %v1391_v8  ;;  %v1697_v55 = vmax.f32 %v1623_v56, 0.0 }
 0x2fa   :  { %v1724_v60 = vmax.f32 %v1480_v4, 0.0 }
 0x2fb   :  { %v1535_v1 = vpop.f32.mrf.mxu0 }
 0x2fc   :  { %v1536_v50 = vadd.f32 %v1535_v1, %v3495_v44  ;;  %v1624_v9 = vpop.f32.mrf.mxu1 }
 0x2fd   :  { %v1392_v41 = vpop.f32.mrf.mxu2 }
 0x2fe   :  { %v1625_v42 = vadd.f32 %v1624_v9, %v1536_v50  ;;  %v1393_v62 = vadd.f32 %v1392_v41, %v3408_v31  ;;  %v3580_v50 = vstv %s3651_s8  ;;  %s2671_s8 = smov [#allocation8]  }
 0x2ff   :  { %v1481_v20 = vpop.f32.mrf.mxu3  ;;  %s2112_s11 = sshll.u32 %s2671_s8, 4  ;;  %s2113_s11 = int_to_ptr.vmem [resolvable:$true] %s2112_s11 }
 0x300   :  { %v1699_v35 = vmax.f32 %v1625_v42, 0.0  ;;  %v1482_v5 = vadd.f32 %v1481_v20, %v1393_v62 }
 0x302   :  { %v1749_v46 = vpack.c.bf16 %v1699_v35, %v1697_v55  ;;  %v1726_v37 = vmax.f32 %v1482_v5, 0.0  ;;  %1936 = vmatmul.bf16.gmra.mxu2 %v3498_v12 }
 0x303   :  { %v1538_v6 = vpop.f32.mrf.mxu0 }
 0x304   :  { %v1627_v30 = vpop.f32.mrf.mxu1  ;;  %2025 = vmatmul.bf16.gmra.mxu3 %v1749_v46  ;;  %v3561_v34 = vpack.c.bf16 %v1726_v37, %v1724_v60  ;;  %v1539_v2 = vadd.f32 %v1538_v6, %v3495_v44 }
 0x305   :  { %v1395_v36 = vpop.f32.mrf.mxu2 }
 0x306   :  { %v1396_v15 = vadd.f32 %v1395_v36, %v3408_v31  ;;  %1577 = vmatmul.bf16.gmra.mxu0 %v3411_v3  ;;  %v1628_v38 = vadd.f32 %v1627_v30, %v1539_v2 }
 0x307   :  { %1666 = vmatmul.bf16.gmra.mxu1 %v3492_v58  ;;  %v1484_v45 = vpop.f32.mrf.mxu3 }
 0x308   :  { %v1485_v26 = vadd.f32 %v1484_v45, %v1396_v15  ;;  %v1701_v27 = vmax.f32 %v1628_v38, 0.0 }
 0x30a   :  { %v1728_v3 = vmax.f32 %v1485_v26, 0.0 }
 0x30b   :  { %v1540_v48 = vpop.f32.mrf.mxu0 }
 0x30c   :  { %v1541_v12 = vadd.f32 %v1540_v48, %v3495_v44  ;;  %v1629_v22 = vpop.f32.mrf.mxu1 }
 0x30d   :  { %v1397_v52 = vpop.f32.mrf.mxu2 }
 0x30e   :  { %v1630_v18 = vadd.f32 %v1629_v22, %v1541_v12  ;;  %v1398_v33 = vadd.f32 %v1397_v52, %v3408_v31 }
 0x30f   :  { %v1486_v32 = vpop.f32.mrf.mxu3 }
 0x310   :  { %v1703_v0 = vmax.f32 %v1630_v18, 0.0  ;;  %v1487_v19 = vadd.f32 %v1486_v32, %v1398_v33 }
 0x312   :  { %v1751_v43 = vpack.c.bf16 %v1703_v0, %v1701_v27  ;;  %v1730_v58 = vmax.f32 %v1487_v19, 0.0  ;;  %1941 = vmatmul.bf16.gmra.mxu2 %v3507_v54 }
 0x313   :  { %v1543_v47 = vpop.f32.mrf.mxu0 }
 0x314   :  { %v1632_v28 = vpop.f32.mrf.mxu1  ;;  %2030 = vmatmul.bf16.gmra.mxu3 %v1751_v43  ;;  %v3570_v51 = vpack.c.bf16 %v1730_v58, %v1728_v3  ;;  %v1544_v59 = vadd.f32 %v1543_v47, %v3495_v44 }
 0x315   :  { %v1400_v11 = vpop.f32.mrf.mxu2 }
 0x316   :  { %v1401_v57 = vadd.f32 %v1400_v11, %v3408_v31  ;;  %v1633_v24 = vadd.f32 %v1632_v28, %v1544_v59 }
 0x317   :  { %v1489_v13 = vpop.f32.mrf.mxu3 }
 0x318   :  { %v1490_v49 = vadd.f32 %v1489_v13, %v1401_v57  ;;  %v1705_v39 = vmax.f32 %v1633_v24, 0.0 }
 0x31a   :  { %v1732_v23 = vmax.f32 %v1490_v49, 0.0 }
 0x31b   :  { %v1545_v10 = vpop.f32.mrf.mxu0 }
 0x31c   :  { %v1546_v29 = vadd.f32 %v1545_v10, %v3495_v44  ;;  %v1634_v53 = vpop.f32.mrf.mxu1 }
 0x31d   :  { %v1402_v17 = vpop.f32.mrf.mxu2 }
 0x31e   :  { %v1635_v7 = vadd.f32 %v1634_v53, %v1546_v29  ;;  %v1403_v54 = vadd.f32 %v1402_v17, %v3408_v31 }
 0x31f   :  { %v1491_v21 = vpop.f32.mrf.mxu3 }
 0x320   :  { %v1707_v8 = vmax.f32 %v1635_v7, 0.0  ;;  %v1492_v40 = vadd.f32 %v1491_v21, %v1403_v54 }
 0x322   :  { %v1753_v4 = vpack.c.bf16 %v1707_v8, %v1705_v39  ;;  %v1734_v1 = vmax.f32 %v1492_v40, 0.0  ;;  %1946 = vmatmul.bf16.gmra.mxu2 %v3516_v63 }
 0x323   :  { %v1548_v56 = vpop.f32.mrf.mxu0 }
 0x324   :  { %v1637_v9 = vpop.f32.mrf.mxu1  ;;  %2035 = vmatmul.bf16.gmra.mxu3 %v1753_v4  ;;  %v3582_v41 = vpack.c.bf16 %v1734_v1, %v1732_v23  ;;  %v1549_v20 = vadd.f32 %v1548_v56, %v3495_v44 }
 0x325   :  { %v1907_v31 = vpop.f32.mrf.mxu2 }
 0x326   :  { %v1908_v42 = vadd.f32 %v1907_v31, %v3580_v50  ;;  %v1638_v63 = vadd.f32 %v1637_v9, %v1549_v20 }
 0x327   :  { %v1996_v62 = vpop.f32.mrf.mxu3 }
 0x328   :  { %v1997_v55 = vadd.f32 %v1996_v62, %v1908_v42  ;;  %v1709_v36 = vmax.f32 %v1638_v63, 0.0 }
 0x32a   :  { %2076 = vst [vmem:[#allocation8] sm:$0xff] %v1997_v55 }
 0x32b   :  { %v1550_v35 = vpop.f32.mrf.mxu0 }
 0x32c   :  { %v1551_v5 = vadd.f32 %v1550_v35, %v3495_v44  ;;  %v1639_v60 = vpop.f32.mrf.mxu1 }
 0x32d   :  { %v1909_v46 = vpop.f32.mrf.mxu2 }
 0x32e   :  { %v1640_v37 = vadd.f32 %v1639_v60, %v1551_v5  ;;  %v1910_v6 = vadd.f32 %v1909_v46, %v3580_v50 }
 0x32f   :  { %v1998_v30 = vpop.f32.mrf.mxu3 }
 0x330   :  { %v1711_v15 = vmax.f32 %v1640_v37, 0.0  ;;  %v1999_v45 = vadd.f32 %v1998_v30, %v1910_v6 }
 0x332   :  { %v1755_v2 = vpack.c.bf16 %v1711_v15, %v1709_v36  ;;  %2077 = vst [vmem:[#allocation8 + $0x8] sm:$0xff] %v1999_v45  ;;  %1951 = vmatmul.bf16.gmra.mxu2 %v3525_v25 }
 0x333   :  { %v1553_v26 = vpop.f32.mrf.mxu0 }
 0x334   :  { %v1642_v48 = vpop.f32.mrf.mxu1  ;;  %2040 = vmatmul.bf16.gmra.mxu3 %v1755_v2  ;;  %v1554_v52 = vadd.f32 %v1553_v26, %v3495_v44 }
 0x335   :  { %v1912_v38 = vpop.f32.mrf.mxu2 }
 0x336   :  { %v1913_v12 = vadd.f32 %v1912_v38, %v3580_v50  ;;  %v1643_v32 = vadd.f32 %v1642_v48, %v1554_v52 }
 0x337   :  { %v2001_v22 = vpop.f32.mrf.mxu3 }
 0x338   :  { %v2002_v18 = vadd.f32 %v2001_v22, %v1913_v12  ;;  %v1713_v58 = vmax.f32 %v1643_v32, 0.0 }
 0x33a   :  { %2078 = vst [vmem:[#allocation8 + $0x10] sm:$0xff] %v2002_v18 }
 0x33b   :  { %v1555_v33 = vpop.f32.mrf.mxu0 }
 0x33c   :  { %v1556_v27 = vadd.f32 %v1555_v33, %v3495_v44  ;;  %v1644_v0 = vpop.f32.mrf.mxu1 }
 0x33d   :  { %v1914_v19 = vpop.f32.mrf.mxu2 }
 0x33e   :  { %v1645_v3 = vadd.f32 %v1644_v0, %v1556_v27  ;;  %v1915_v25 = vadd.f32 %v1914_v19, %v3580_v50 }
 0x33f   :  { %v2003_v43 = vpop.f32.mrf.mxu3 }
 0x340   :  { %v1715_v47 = vmax.f32 %v1645_v3, 0.0  ;;  %v2004_v28 = vadd.f32 %v2003_v43, %v1915_v25 }
 0x342   :  { %v1757_v11 = vpack.c.bf16 %v1715_v47, %v1713_v58  ;;  %2079 = vst [vmem:[#allocation8 + $0x18] sm:$0xff] %v2004_v28  ;;  %1956 = vmatmul.bf16.gmra.mxu2 %v3534_v14 }
 0x343   :  { %v1558_v57 = vpop.f32.mrf.mxu0 }
 0x344   :  { %v1647_v13 = vpop.f32.mrf.mxu1  ;;  %2045 = vmatmul.bf16.gmra.mxu3 %v1757_v11  ;;  %v1559_v24 = vadd.f32 %v1558_v57, %v3495_v44 }
 0x345   :  { %v1917_v59 = vpop.f32.mrf.mxu2 }
 0x346   :  { %v1918_v49 = vadd.f32 %v1917_v59, %v3580_v50  ;;  %v1648_v17 = vadd.f32 %v1647_v13, %v1559_v24 }
 0x347   :  { %v2006_v10 = vpop.f32.mrf.mxu3 }
 0x348   :  { %v2007_v29 = vadd.f32 %v2006_v10, %v1918_v49  ;;  %v1717_v40 = vmax.f32 %v1648_v17, 0.0 }
 0x34a   :  { %2080 = vst [vmem:[#allocation8 + $0x20] sm:$0xff] %v2007_v29 }
 0x34b   :  { %v1560_v53 = vpop.f32.mrf.mxu0 }
 0x34c   :  { %v1561_v7 = vadd.f32 %v1560_v53, %v3495_v44  ;;  %v1649_v54 = vpop.f32.mrf.mxu1 }
 0x34d   :  { %v1919_v21 = vpop.f32.mrf.mxu2 }
 0x34e   :  { %v1650_v39 = vadd.f32 %v1649_v54, %v1561_v7  ;;  %v1920_v14 = vadd.f32 %v1919_v21, %v3580_v50 }
 0x34f   :  { %v2008_v8 = vpop.f32.mrf.mxu3 }
 0x350   :  { %v1719_v23 = vmax.f32 %v1650_v39, 0.0  ;;  %v2009_v4 = vadd.f32 %v2008_v8, %v1920_v14 }
 0x352   :  { %v1759_v1 = vpack.c.bf16 %v1719_v23, %v1717_v40  ;;  %2081 = vst [vmem:[#allocation8 + $0x28] sm:$0xff] %v2009_v4  ;;  %1961 = vmatmul.bf16.gmra.mxu2 %v3543_v16 }
 0x353   :  { %v1563_v56 = vpop.f32.mrf.mxu0 }
 0x354   :  { %v1652_v9 = vpop.f32.mrf.mxu1  ;;  %2050 = vmatmul.bf16.gmra.mxu3 %v1759_v1  ;;  %v1564_v20 = vadd.f32 %v1563_v56, %v3495_v44 }
 0x355   :  { %v1922_v31 = vpop.f32.mrf.mxu2 }
 0x356   :  { %v1923_v42 = vadd.f32 %v1922_v31, %v3580_v50  ;;  %v1653_v63 = vadd.f32 %v1652_v9, %v1564_v20 }
 0x357   :  { %v2011_v62 = vpop.f32.mrf.mxu3 }
 0x358   :  { %v2012_v55 = vadd.f32 %v2011_v62, %v1923_v42  ;;  %v1721_v30 = vmax.f32 %v1653_v63, 0.0 }
 0x35a   :  { %2082 = vst [vmem:[#allocation8 + $0x30] sm:$0xff] %v2012_v55 }
 0x35b   :  { %v1565_v35 = vpop.f32.mrf.mxu0 }
 0x35c   :  { %v1566_v5 = vadd.f32 %v1565_v35, %v3495_v44  ;;  %v1654_v60 = vpop.f32.mrf.mxu1 }
 0x35d   :  { %v1924_v46 = vpop.f32.mrf.mxu2 }
 0x35e   :  { %v1655_v37 = vadd.f32 %v1654_v60, %v1566_v5  ;;  %v1925_v16 = vadd.f32 %v1924_v46, %v3580_v50 }
 0x35f   :  { %v2013_v6 = vpop.f32.mrf.mxu3 }
 0x360   :  { %v1723_v36 = vmax.f32 %v1655_v37, 0.0  ;;  %v2014_v15 = vadd.f32 %v2013_v6, %v1925_v16 }
 0x362   :  { %v1761_v45 = vpack.c.bf16 %v1723_v36, %v1721_v30  ;;  %2083 = vst [vmem:[#allocation8 + $0x38] sm:$0xff] %v2014_v15  ;;  %1966 = vmatmul.bf16.gmra.mxu2 %v3552_v61 }
 0x363   :  { %v1568_v2 = vpop.f32.mrf.mxu0 }
 0x364   :  { %v1657_v26 = vpop.f32.mrf.mxu1  ;;  %2055 = vmatmul.bf16.gmra.mxu3 %v1761_v45  ;;  %v1569_v22 = vadd.f32 %v1568_v2, %v3495_v44 }
 0x365   :  { %v1927_v48 = vpop.f32.mrf.mxu2 }
 0x366   :  { %v1928_v38 = vadd.f32 %v1927_v48, %v3580_v50  ;;  %v1658_v33 = vadd.f32 %v1657_v26, %v1569_v22 }
 0x367   :  { %v2016_v12 = vpop.f32.mrf.mxu3 }
 0x368   :  { %v2017_v52 = vadd.f32 %v2016_v12, %v1928_v38  ;;  %v1725_v25 = vmax.f32 %v1658_v33, 0.0 }
 0x36a   :  { %2084 = vst [vmem:[#allocation8 + $0x40] sm:$0xff] %v2017_v52 }
 0x36b   :  { %v1570_v18 = vpop.f32.mrf.mxu0 }
 0x36c   :  { %v1571_v32 = vadd.f32 %v1570_v18, %v3495_v44  ;;  %v1659_v27 = vpop.f32.mrf.mxu1 }
 0x36d   :  { %v1929_v0 = vpop.f32.mrf.mxu2 }
 0x36e   :  { %v1660_v19 = vadd.f32 %v1659_v27, %v1571_v32  ;;  %v1930_v61 = vadd.f32 %v1929_v0, %v3580_v50 }
 0x36f   :  { %v2018_v3 = vpop.f32.mrf.mxu3 }
 0x370   :  { %v1727_v43 = vmax.f32 %v1660_v19, 0.0  ;;  %v2019_v58 = vadd.f32 %v2018_v3, %v1930_v61 }
 0x372   :  { %v1763_v47 = vpack.c.bf16 %v1727_v43, %v1725_v25  ;;  %2085 = vst [vmem:[#allocation8 + $0x48] sm:$0xff] %v2019_v58  ;;  %1971 = vmatmul.bf16.gmra.mxu2 %v3561_v34 }
 0x373   :  { %v1573_v28 = vpop.f32.mrf.mxu0 }
 0x374   :  { %v1662_v11 = vpop.f32.mrf.mxu1  ;;  %2060 = vmatmul.bf16.gmra.mxu3 %v1763_v47  ;;  %v1574_v49 = vadd.f32 %v1573_v28, %v3495_v44 }
 0x375   :  { %v1932_v57 = vpop.f32.mrf.mxu2 }
 0x376   :  { %v1933_v13 = vadd.f32 %v1932_v57, %v3580_v50  ;;  %v1663_v29 = vadd.f32 %v1662_v11, %v1574_v49 }
 0x377   :  { %v2021_v59 = vpop.f32.mrf.mxu3 }
 0x378   :  { %v2022_v10 = vadd.f32 %v2021_v59, %v1933_v13  ;;  %v1729_v39 = vmax.f32 %v1663_v29, 0.0 }
 0x37a   :  { %2086 = vst [vmem:[#allocation8 + $0x50] sm:$0xff] %v2022_v10 }
 0x37b   :  { %v1575_v24 = vpop.f32.mrf.mxu0 }
 0x37c   :  { %v1576_v53 = vadd.f32 %v1575_v24, %v3495_v44  ;;  %v1664_v17 = vpop.f32.mrf.mxu1 }
 0x37d   :  { %v1934_v7 = vpop.f32.mrf.mxu2 }
 0x37e   :  { %v1665_v54 = vadd.f32 %v1664_v17, %v1576_v53  ;;  %v1935_v34 = vadd.f32 %v1934_v7, %v3580_v50 }
 0x37f   :  { %v2023_v21 = vpop.f32.mrf.mxu3 }
 0x380   :  { %v1731_v14 = vmax.f32 %v1665_v54, 0.0  ;;  %v2024_v8 = vadd.f32 %v2023_v21, %v1935_v34 }
 0x382   :  { %v1765_v40 = vpack.c.bf16 %v1731_v14, %v1729_v39  ;;  %2087 = vst [vmem:[#allocation8 + $0x58] sm:$0xff] %v2024_v8  ;;  %1976 = vmatmul.bf16.gmra.mxu2 %v3570_v51 }
 0x383   :  { %v1578_v23 = vpop.f32.mrf.mxu0 }
 0x384   :  { %v1667_v4 = vpop.f32.mrf.mxu1  ;;  %2065 = vmatmul.bf16.gmra.mxu3 %v1765_v40  ;;  %v1579_v31 = vadd.f32 %v1578_v23, %v3495_v44 }
 0x385   :  { %v1937_v1 = vpop.f32.mrf.mxu2 }
 0x386   :  { %v1938_v56 = vadd.f32 %v1937_v1, %v3580_v50  ;;  %v1668_v20 = vadd.f32 %v1667_v4, %v1579_v31 }
 0x387   :  { %v2026_v9 = vpop.f32.mrf.mxu3 }
 0x388   :  { %v2027_v42 = vadd.f32 %v2026_v9, %v1938_v56  ;;  %v1733_v46 = vmax.f32 %v1668_v20, 0.0 }
 0x38a   :  { %2088 = vst [vmem:[#allocation8 + $0x60] sm:$0xff] %v2027_v42 }
 0x38b   :  { %v1580_v62 = vpop.f32.mrf.mxu0 }
 0x38c   :  { %v1581_v55 = vadd.f32 %v1580_v62, %v3495_v44  ;;  %v1669_v35 = vpop.f32.mrf.mxu1 }
 0x38d   :  { %v1939_v63 = vpop.f32.mrf.mxu2 }
 0x38e   :  { %v1670_v5 = vadd.f32 %v1669_v35, %v1581_v55  ;;  %v1940_v51 = vadd.f32 %v1939_v63, %v3580_v50 }
 0x38f   :  { %v2028_v60 = vpop.f32.mrf.mxu3 }
 0x390   :  { %v1735_v37 = vmax.f32 %v1670_v5, 0.0  ;;  %v2029_v16 = vadd.f32 %v2028_v60, %v1940_v51 }
 0x392   :  { %v1767_v6 = vpack.c.bf16 %v1735_v37, %v1733_v46  ;;  %2089 = vst [vmem:[#allocation8 + $0x68] sm:$0xff] %v2029_v16  ;;  %1981 = vmatmul.bf16.gmra.mxu2 %v3582_v41 }
 0x394   :  { %2070 = vmatmul.bf16.gmra.mxu3 %v1767_v6 }
 0x395   :  { %v1942_v30 = vpop.f32.mrf.mxu2 }
 0x396   :  { %v1943_v36 = vadd.f32 %v1942_v30, %v3580_v50 }
 0x397   :  { %v2031_v15 = vpop.f32.mrf.mxu3 }
 0x398   :  { %v2032_v45 = vadd.f32 %v2031_v15, %v1943_v36 }
 0x39a   :  { %2090 = vst [vmem:[#allocation8 + $0x70] sm:$0xff] %v2032_v45 }
 0x39d   :  { %v1944_v44 = vpop.f32.mrf.mxu2 }
 0x39e   :  { %v1945_v2 = vadd.f32 %v1944_v44, %v3580_v50 }
 0x39f   :  { %v2033_v26 = vpop.f32.mrf.mxu3 }
 0x3a0   :  { %v2034_v48 = vadd.f32 %v2033_v26, %v1945_v2 }
 0x3a2   :  { %2091 = vst [vmem:[#allocation8 + $0x78] sm:$0xff] %v2034_v48 }
 0x3a5   :  { %v1947_v38 = vpop.f32.mrf.mxu2 }
 0x3a6   :  { %v1948_v12 = vadd.f32 %v1947_v38, %v3580_v50 }
 0x3a7   :  { %v2036_v22 = vpop.f32.mrf.mxu3 }
 0x3a8   :  { %v2037_v52 = vadd.f32 %v2036_v22, %v1948_v12 }
 0x3aa   :  { %2092 = vst [vmem:[#allocation8 + $0x80] sm:$0xff] %v2037_v52 }
 0x3ad   :  { %v1949_v41 = vpop.f32.mrf.mxu2 }
 0x3ae   :  { %v1950_v18 = vadd.f32 %v1949_v41, %v3580_v50 }
 0x3af   :  { %v2038_v33 = vpop.f32.mrf.mxu3 }
 0x3b0   :  { %v2039_v32 = vadd.f32 %v2038_v33, %v1950_v18 }
 0x3b2   :  { %2093 = vst [vmem:[#allocation8 + $0x88] sm:$0xff] %v2039_v32 }
 0x3b5   :  { %v1952_v27 = vpop.f32.mrf.mxu2 }
 0x3b6   :  { %v1953_v0 = vadd.f32 %v1952_v27, %v3580_v50 }
 0x3b7   :  { %v2041_v19 = vpop.f32.mrf.mxu3 }
 0x3b8   :  { %v2042_v61 = vadd.f32 %v2041_v19, %v1953_v0 }
 0x3ba   :  { %2094 = vst [vmem:[#allocation8 + $0x90] sm:$0xff] %v2042_v61 }
 0x3bd   :  { %v1954_v3 = vpop.f32.mrf.mxu2 }
 0x3be   :  { %v1955_v25 = vadd.f32 %v1954_v3, %v3580_v50 }
 0x3bf   :  { %v2043_v43 = vpop.f32.mrf.mxu3 }
 0x3c0   :  { %v2044_v58 = vadd.f32 %v2043_v43, %v1955_v25 }
 0x3c2   :  { %2095 = vst [vmem:[#allocation8 + $0x98] sm:$0xff] %v2044_v58 }
 0x3c5   :  { %v1957_v47 = vpop.f32.mrf.mxu2 }
 0x3c6   :  { %v1958_v28 = vadd.f32 %v1957_v47, %v3580_v50 }
 0x3c7   :  { %v2046_v11 = vpop.f32.mrf.mxu3 }
 0x3c8   :  { %v2047_v57 = vadd.f32 %v2046_v11, %v1958_v28 }
 0x3ca   :  { %2096 = vst [vmem:[#allocation8 + $0xa0] sm:$0xff] %v2047_v57 }
 0x3cd   :  { %v1959_v13 = vpop.f32.mrf.mxu2 }
 0x3ce   :  { %v1960_v59 = vadd.f32 %v1959_v13, %v3580_v50 }
 0x3cf   :  { %v2048_v49 = vpop.f32.mrf.mxu3 }
 0x3d0   :  { %v2049_v10 = vadd.f32 %v2048_v49, %v1960_v59 }
 0x3d2   :  { %2097 = vst [vmem:[#allocation8 + $0xa8] sm:$0xff] %v2049_v10 }
 0x3d5   :  { %v1962_v24 = vpop.f32.mrf.mxu2 }
 0x3d6   :  { %v1963_v29 = vadd.f32 %v1962_v24, %v3580_v50 }
 0x3d7   :  { %v2051_v53 = vpop.f32.mrf.mxu3 }
 0x3d8   :  { %v2052_v17 = vadd.f32 %v2051_v53, %v1963_v29 }
 0x3da   :  { %2098 = vst [vmem:[#allocation8 + $0xb0] sm:$0xff] %v2052_v17 }
 0x3dd   :  { %v1964_v7 = vpop.f32.mrf.mxu2 }
 0x3de   :  { %v1965_v54 = vadd.f32 %v1964_v7, %v3580_v50 }
 0x3df   :  { %v2053_v34 = vpop.f32.mrf.mxu3 }
 0x3e0   :  { %v2054_v21 = vadd.f32 %v2053_v34, %v1965_v54 }
 0x3e2   :  { %2099 = vst [vmem:[#allocation8 + $0xb8] sm:$0xff] %v2054_v21 }
 0x3e5   :  { %v1967_v39 = vpop.f32.mrf.mxu2 }
 0x3e6   :  { %v1968_v14 = vadd.f32 %v1967_v39, %v3580_v50 }
 0x3e7   :  { %v2056_v8 = vpop.f32.mrf.mxu3 }
 0x3e8   :  { %v2057_v40 = vadd.f32 %v2056_v8, %v1968_v14 }
 0x3ea   :  { %2100 = vst [vmem:[#allocation8 + $0xc0] sm:$0xff] %v2057_v40 }
 0x3ed   :  { %v1969_v23 = vpop.f32.mrf.mxu2 }
 0x3ee   :  { %v1970_v4 = vadd.f32 %v1969_v23, %v3580_v50 }
 0x3ef   :  { %v2058_v1 = vpop.f32.mrf.mxu3 }
 0x3f0   :  { %v2059_v56 = vadd.f32 %v2058_v1, %v1970_v4 }
 0x3f2   :  { %2101 = vst [vmem:[#allocation8 + $0xc8] sm:$0xff] %v2059_v56 }
 0x3f5   :  { %v1972_v9 = vpop.f32.mrf.mxu2 }
 0x3f6   :  { %v1973_v31 = vadd.f32 %v1972_v9, %v3580_v50 }
 0x3f7   :  { %v2061_v42 = vpop.f32.mrf.mxu3 }
 0x3f8   :  { %v2062_v62 = vadd.f32 %v2061_v42, %v1973_v31 }
 0x3fa   :  { %2102 = vst [vmem:[#allocation8 + $0xd0] sm:$0xff] %v2062_v62 }
 0x3fd   :  { %v1974_v20 = vpop.f32.mrf.mxu2 }
 0x3fe   :  { %v1975_v55 = vadd.f32 %v1974_v20, %v3580_v50 }
 0x3ff   :  { %v2063_v35 = vpop.f32.mrf.mxu3 }
 0x400   :  { %v2064_v63 = vadd.f32 %v2063_v35, %v1975_v55 }
 0x402   :  { %2103 = vst [vmem:[#allocation8 + $0xd8] sm:$0xff] %v2064_v63 }
 0x405   :  { %v1977_v5 = vpop.f32.mrf.mxu2 }
 0x406   :  { %v1978_v51 = vadd.f32 %v1977_v5, %v3580_v50 }
 0x407   :  { %v2066_v60 = vpop.f32.mrf.mxu3 }
 0x408   :  { %v2067_v46 = vadd.f32 %v2066_v60, %v1978_v51 }
 0x40a   :  { %2104 = vst [vmem:[#allocation8 + $0xe0] sm:$0xff] %v2067_v46 }
 0x40d   :  { %v1979_v37 = vpop.f32.mrf.mxu2 }
 0x40e   :  { %v1980_v16 = vadd.f32 %v1979_v37, %v3580_v50 }
 0x40f   :  { %v2068_v6 = vpop.f32.mrf.mxu3 }
 0x410   :  { %v2069_v30 = vadd.f32 %v2068_v6, %v1980_v16 }
 0x412   :  { %2105 = vst [vmem:[#allocation8 + $0xe8] sm:$0xff] %v2069_v30 }
 0x415   :  { %v1982_v36 = vpop.f32.mrf.mxu2 }
 0x416   :  { %v1983_v15 = vadd.f32 %v1982_v36, %v3580_v50 }
 0x417   :  { %v2071_v45 = vpop.f32.mrf.mxu3 }
 0x418   :  { %v2072_v44 = vadd.f32 %v2071_v45, %v1983_v15 }
 0x41a   :  { %2106 = vst [vmem:[#allocation8 + $0xf0] sm:$0xff] %v2072_v44 }
 0x41d   :  { %v1984_v2 = vpop.f32.mrf.mxu2 }
 0x41e   :  { %v1985_v26 = vadd.f32 %v1984_v2, %v3580_v50 }
 0x41f   :  { %v2073_v48 = vpop.f32.mrf.mxu3 }
 0x420   :  { %v2074_v38 = vadd.f32 %v2073_v48, %v1985_v26 }
 0x422   :  { %2107 = vst [vmem:[#allocation8 + $0xf8] sm:$0xff] %v2074_v38 }
 0x423   :  { %2120 = dma.vmem_to_hbm [thread:$0]  %s2113_s11, 4096, %s2115_s14, [#allocation5], %s2666_s17, %s2666_s17, %s2667_s18  }
 0x424   :  { %2663 = dma.done.wait [#allocation5], 4096  }
 0x425   :  { %2664 = vsyncadd [#allocation5], 4294963200 }
 0x426   :  { %2125 = vsyncpa [#allocation4], 1 }
 0x427   :  { %2126 = vsyncpa [#allocation7], 1 }
 0x428   :  { %2127 = vsyncpa [#allocation5], 1 }

</bundles_post_ra>
